<compile_context>
chip_gen: v7x
topology: tpu7x:2x2x1
jax: 0.10.0
libtpu: 0.0.40
codegen_flags: <defaults>
</compile_context>

<pallas_src>
import jax
import jax.numpy as jnp
from jax import lax
from jax.experimental import pallas as pl
from jax.experimental.pallas import tpu as pltpu


# ----------------------------------------------------------------------------
# Fused BiLSTM kernel: hoisted input-projection GEMM + single fused fwd/rev
# recurrence.  Emits the batch-first (B, T, 2H) bf16 output, plus (hn, cn).
# ----------------------------------------------------------------------------
def bilstm_kernel(xc_ref, w_x_ref, w_h_ref, b_ref, h0_ref, c0_ref,
                  out_ref, hn_ref, cn_ref, xp_ref, hall_ref):
    B, HH = h0_ref.shape              # HH = 2*H  (state = [h_fwd | h_rev] on lanes)
    H = HH // 2
    T = xp_ref.shape[0]
    G = xp_ref.shape[2]               # 4 * HH

    # (1) Hoisted input projection: one GEMM covering every timestep and both
    #     directions, bias folded in.  Gate columns are direction-interleaved:
    #     [i_f|i_r | f_f|f_r | g_f|g_r | o_f|o_r]  -> width 4*HH.
    xp = (jnp.dot(xc_ref[...], w_x_ref[...], preferred_element_type=jnp.float32)
          + b_ref[...])                                   # (T*B, 4*HH) f32
    # One-time static split-store into the (T, B, 4*HH) scratch so the serial
    # recurrence can use an aligned leading-axis load `xp_ref[t]`.
    for t in range(T):
        xp_ref[t] = xp[t * B:(t + 1) * B, :]

    w_h = w_h_ref[...]                # (HH, 4*HH) bf16, block-diagonal per direction

    def step(t, carry):
        h, c = carry                  # (B, HH) f32
        # One recurrent matmul per step covering both directions.
        gates = xp_ref[t] + jnp.dot(h.astype(jnp.bfloat16), w_h,
                                    preferred_element_type=jnp.float32)
        i_g = jax.nn.sigmoid(gates[:, 0 * HH:1 * HH])
        f_g = jax.nn.sigmoid(gates[:, 1 * HH:2 * HH])
        g_g = jnp.tanh(gates[:, 2 * HH:3 * HH])
        o_g = jax.nn.sigmoid(gates[:, 3 * HH:4 * HH])
        c = f_g * c + i_g * g_g
        h = o_g * jnp.tanh(c)
        # Single full-width store per step (time-major staging buffer); no
        # per-batch / per-direction scatter on the critical path.
        hall_ref[t] = h
        return (h, c)

    h_fin, c_fin = lax.fori_loop(0, T, step, (h0_ref[...], c0_ref[...]),
                                 unroll=min(T, 8))
    hn_ref[0] = h_fin[:, 0:H]
    hn_ref[1] = h_fin[:, H:HH]
    cn_ref[0] = c_fin[:, 0:H]
    cn_ref[1] = c_fin[:, H:HH]

    # (2) Post-loop: assemble the batch-first (B, T, 2H) bf16 output.
    #     Forward half of time t comes from loop step t; reverse half from
    #     loop step T-1-t.  All indices static -> simple, off-critical-path
    #     stores (2*B*T tiny stores total, not per recurrence step).
    for t in range(T):
        hf = hall_ref[t]                   # (B, HH)
        hr = hall_ref[T - 1 - t]           # (B, HH)
        row = jnp.concatenate([hf[:, 0:H], hr[:, H:HH]], axis=-1)   # (B, HH) f32
        row = row.astype(out_ref.dtype)
        for b in range(B):
            out_ref[b, t:t + 1, :] = row[b:b + 1, :]


# ----------------------------------------------------------------------------
# Single-head self-attention kernel.  One invocation handles the whole batch
# (B is tiny); per-batch extraction uses leading-dim squeezes only.
# ----------------------------------------------------------------------------
def attn_kernel(x_ref, mrow_ref, mcol_ref, w_in_ref, b_in_ref,
                w_out_ref, b_out_ref, o_ref):
    B, T, E = x_ref.shape
    x = x_ref[...]                         # (B, T, E) bf16 (BiLSTM output, no cast)
    mrow = mrow_ref[...]                   # (B, 1, T) f32
    mcol = mcol_ref[...]                   # (B, T, 1) f32
    w_in = w_in_ref[...]                   # (E, 3E) bf16
    b_in = b_in_ref[...]                   # (1, 3E) f32
    w_out = w_out_ref[...]                 # (E, E) bf16
    b_out = b_out_ref[...]                 # (1, E) f32

    scale = 1.0 / (E ** 0.5)               # head_dim = E (num_heads = 1)
    rows = lax.broadcasted_iota(jnp.int32, (T, T), 0)
    cols = lax.broadcasted_iota(jnp.int32, (T, T), 1)
    eye = rows == cols

    for b in range(B):                     # static, B small
        xb = x[b]                          # (T, E)
        qkv = (jnp.dot(xb, w_in, preferred_element_type=jnp.float32)
               + b_in)                     # (T, 3E) f32
        q = qkv[:, 0 * E:1 * E] * scale
        k = qkv[:, 1 * E:2 * E]
        v = qkv[:, 2 * E:3 * E]

        # q @ k^T with no explicit transpose of k.
        s = lax.dot_general(q.astype(jnp.bfloat16), k.astype(jnp.bfloat16),
                            dimension_numbers=(((1,), (1,)), ((), ())),
                            preferred_element_type=jnp.float32)      # (T, T)

        # allowed[i, j] = (mask[i] & mask[j]) | (i == j), built in-kernel from
        # the per-sequence binary mask (no (T,T) mask input from HBM).
        allowed = jnp.logical_or(
            jnp.logical_and(mcol[b] > 0.0, mrow[b] > 0.0), eye)
        s = jnp.where(allowed, s, -1e30)

        s = s - jnp.max(s, axis=-1, keepdims=True)
        p = jnp.exp(s)
        p = p * pl.reciprocal(jnp.sum(p, axis=-1, keepdims=True), approx=True)

        ctx = jnp.dot(p.astype(jnp.bfloat16), v.astype(jnp.bfloat16),
                      preferred_element_type=jnp.float32)             # (T, E)
        out = (jnp.dot(ctx.astype(jnp.bfloat16), w_out,
                       preferred_element_type=jnp.float32) + b_out)
        o_ref[b] = out.astype(o_ref.dtype)


# ----------------------------------------------------------------------------
# Parameter init (deterministic, PyTorch-like shapes)
# ----------------------------------------------------------------------------
def init_params(key, input_size, hidden_size):
    H = hidden_size
    E = 2 * H
    keys = jax.random.split(key, 10)
    s_lstm = H ** -0.5
    s_att = E ** -0.5

    def u(k, shape, s):
        return jax.random.uniform(k, shape, jnp.float32, -s, s)

    return dict(
        w_ih_f=u(keys[0], (4 * H, input_size), s_lstm),
        w_hh_f=u(keys[1], (4 * H, H), s_lstm),
        b_ih_f=u(keys[2], (4 * H,), s_lstm),
        b_hh_f=u(keys[3], (4 * H,), s_lstm),
        w_ih_r=u(keys[4], (4 * H, input_size), s_lstm),
        w_hh_r=u(keys[5], (4 * H, H), s_lstm),
        b_ih_r=u(keys[6], (4 * H,), s_lstm),
        b_hh_r=u(keys[7], (4 * H,), s_lstm),
        in_proj_w=u(keys[8], (3 * E, E), s_att),
        in_proj_b=jnp.zeros((3 * E,), jnp.float32),
        out_proj_w=u(keys[9], (E, E), s_att),
        out_proj_b=jnp.zeros((E,), jnp.float32),
    )


def _interleave_dirs(wf, wr, H):
    """wf, wr: (rows, 4H) with gate blocks [i|f|g|o].  Returns (rows, 8H) with the
    two directions interleaved per gate: [i_f|i_r|f_f|f_r|g_f|g_r|o_f|o_r]."""
    rows = wf.shape[0]
    return jnp.stack([wf.reshape(rows, 4, H), wr.reshape(rows, 4, H)],
                     axis=2).reshape(rows, 8 * H)


def pack_params(params, input_size, hidden_size):
    """One-time kernel-operand packing (hoisted out of the forward path)."""
    H = hidden_size
    I = input_size
    zi = jnp.zeros((I, 4 * H), jnp.float32)
    zh = jnp.zeros((H, 4 * H), jnp.float32)
    w_x = jnp.concatenate(
        [_interleave_dirs(params['w_ih_f'].T, zi, H),
         _interleave_dirs(zi, params['w_ih_r'].T, H)],
        axis=0).astype(jnp.bfloat16)                             # (2I, 8H)
    w_h = jnp.concatenate(
        [_interleave_dirs(params['w_hh_f'].T, zh, H),
         _interleave_dirs(zh, params['w_hh_r'].T, H)],
        axis=0).astype(jnp.bfloat16)                             # (2H, 8H) block-diag
    b_gate = _interleave_dirs((params['b_ih_f'] + params['b_hh_f'])[None, :],
                              (params['b_ih_r'] + params['b_hh_r'])[None, :],
                              H)                                 # (1, 8H) f32
    return dict(
        w_x=w_x, w_h=w_h, b_gate=b_gate,
        w_in=params['in_proj_w'].T.astype(jnp.bfloat16),         # (E, 3E)
        b_in=params['in_proj_b'][None, :],                       # (1, 3E)
        w_out=params['out_proj_w'].T.astype(jnp.bfloat16),       # (E, E)
        b_out=params['out_proj_b'][None, :],                     # (1, E)
    )


# ----------------------------------------------------------------------------
# Forward wrapper (mirrors Att_BiLSTM.forward)
# ----------------------------------------------------------------------------
def att_bilstm_forward(x, banary_mask, packed, hidden_size, state_key):
    B, T, I = x.shape
    H = hidden_size
    E = 2 * H

    # mirrors torch.randn(...) random initial hidden/cell states in forward()
    kh, kc = jax.random.split(state_key)
    h0 = jax.random.normal(kh, (2, B, H), jnp.float32)
    c0 = jax.random.normal(kc, (2, B, H), jnp.float32)
    h0_wide = jnp.concatenate([h0[0], h0[1]], axis=-1)           # (B, 2H)
    c0_wide = jnp.concatenate([c0[0], c0[1]], axis=-1)           # (B, 2H)

    # ---- BiLSTM operand prep: xc row (t*B + b) = [x[b, t, :], x[b, T-1-t, :]] ----
    x_tm = jnp.transpose(x, (1, 0, 2))                           # (T, B, I)
    x_cat = jnp.concatenate([x_tm, jnp.flip(x_tm, axis=0)], axis=-1)  # (T, B, 2I)
    xc = x_cat.reshape(T * B, 2 * I).astype(jnp.bfloat16)

    out_bf, hn, cn = pl.pallas_call(
        bilstm_kernel,
        out_shape=(
            jax.ShapeDtypeStruct((B, T, E), jnp.bfloat16),       # batch-first (B,T,2H)
            jax.ShapeDtypeStruct((2, B, H), jnp.float32),
            jax.ShapeDtypeStruct((2, B, H), jnp.float32),
        ),
        scratch_shapes=[
            pltpu.VMEM((T, B, 4 * E), jnp.float32),              # xp: projected gates
            pltpu.VMEM((T, B, E), jnp.float32),                  # hall: per-step states
        ],
    )(xc, packed['w_x'], packed['w_h'], packed['b_gate'], h0_wide, c0_wide)

    # ---- attention: mask built in-kernel from the (B,T) binary mask ------------
    m = banary_mask.astype(jnp.float32)
    mask_row = m[:, None, :]                                     # (B, 1, T)
    mask_col = m[:, :, None]                                     # (B, T, 1)

    attn_out = pl.pallas_call(
        attn_kernel,
        out_shape=jax.ShapeDtypeStruct((B, T, E), jnp.float32),
    )(out_bf, mask_row, mask_col,
      packed['w_in'], packed['b_in'], packed['w_out'], packed['b_out'])

    return attn_out, (hn, cn)


if __name__ == "__main__":
    input_size, hidden_size = 16, 32
    B, T = 2, 8

    key = jax.random.PRNGKey(0)
    k_params, k_x, k_state = jax.random.split(key, 3)

    params = init_params(k_params, input_size, hidden_size)
    packed = pack_params(params, input_size, hidden_size)        # one-time packing
    x = jax.random.normal(k_x, (B, T, input_size), jnp.float32)
    banary_mask = jnp.array(
        [[1, 1, 1, 1, 1, 1, 1, 1],
         [1, 1, 1, 1, 1, 0, 0, 0]], dtype=jnp.float32)

    forward = jax.jit(att_bilstm_forward, static_argnums=(3,))
    attn_out, (hn, cn) = forward(x, banary_mask, packed, hidden_size, k_state)
    jax.block_until_ready((attn_out, hn, cn))

    assert attn_out.shape == (B, T, 2 * hidden_size)
    assert hn.shape == (2, B, hidden_size)
    assert cn.shape == (2, B, hidden_size)
    assert bool(jnp.all(jnp.isfinite(attn_out)))
    assert bool(jnp.all(jnp.isfinite(hn))) and bool(jnp.all(jnp.isfinite(cn)))
    print("KERNEL_OK")
</pallas_src>

<mosaic_0001>
module attributes {stable_mosaic.version = 11 : i64} {
  func.func @attn_kernel(%arg0: memref<2x8x64xbf16, #tpu.memory_space<vmem>>, %arg1: memref<2x1x8xf32, #tpu.memory_space<vmem>>, %arg2: memref<2x8x1xf32, #tpu.memory_space<vmem>>, %arg3: memref<64x192xbf16, #tpu.memory_space<vmem>>, %arg4: memref<1x192xf32, #tpu.memory_space<vmem>>, %arg5: memref<64x64xbf16, #tpu.memory_space<vmem>>, %arg6: memref<1x64xf32, #tpu.memory_space<vmem>>, %arg7: memref<2x8x64xf32, #tpu.memory_space<vmem>>) attributes {dimension_semantics = [], scalar_prefetch = 0 : i64, scratch_operands = 0 : i64, tpu.core_type = #tpu.core_type<tc>} {
    %c0 = arith.constant 0 : index
    %c0_0 = arith.constant 0 : index
    %c0_1 = arith.constant 0 : index
    %0 = vector.load %arg0[%c0, %c0_0, %c0_1] : memref<2x8x64xbf16, #tpu.memory_space<vmem>>, vector<2x8x64xbf16>
    %c0_2 = arith.constant 0 : index
    %c0_3 = arith.constant 0 : index
    %c0_4 = arith.constant 0 : index
    %1 = vector.load %arg1[%c0_2, %c0_3, %c0_4] : memref<2x1x8xf32, #tpu.memory_space<vmem>>, vector<2x1x8xf32>
    %c0_5 = arith.constant 0 : index
    %c0_6 = arith.constant 0 : index
    %c0_7 = arith.constant 0 : index
    %2 = vector.load %arg2[%c0_5, %c0_6, %c0_7] : memref<2x8x1xf32, #tpu.memory_space<vmem>>, vector<2x8x1xf32>
    %c0_8 = arith.constant 0 : index
    %c0_9 = arith.constant 0 : index
    %3 = vector.load %arg3[%c0_8, %c0_9] : memref<64x192xbf16, #tpu.memory_space<vmem>>, vector<64x192xbf16>
    %c0_10 = arith.constant 0 : index
    %c0_11 = arith.constant 0 : index
    %4 = vector.load %arg4[%c0_10, %c0_11] : memref<1x192xf32, #tpu.memory_space<vmem>>, vector<1x192xf32>
    %c0_12 = arith.constant 0 : index
    %c0_13 = arith.constant 0 : index
    %5 = vector.load %arg5[%c0_12, %c0_13] : memref<64x64xbf16, #tpu.memory_space<vmem>>, vector<64x64xbf16>
    %c0_14 = arith.constant 0 : index
    %c0_15 = arith.constant 0 : index
    %6 = vector.load %arg6[%c0_14, %c0_15] : memref<1x64xf32, #tpu.memory_space<vmem>>, vector<1x64xf32>
    %7 = tpu.iota {dimensions = array<i32: 0>} : vector<8x8xi32>
    %8 = tpu.iota {dimensions = array<i32: 1>} : vector<8x8xi32>
    %9 = arith.cmpi eq, %7, %8 : vector<8x8xi32>
    %10 = vector.extract_strided_slice %0 {offsets = [0, 0, 0], sizes = [1, 8, 64], strides = [1, 1, 1]} : vector<2x8x64xbf16> to vector<1x8x64xbf16>
    %11 = vector.shape_cast %10 : vector<1x8x64xbf16> to vector<8x64xbf16>
    %cst = arith.constant dense<0.000000e+00> : vector<8x192xf32>
    %12 = tpu.matmul %11, %3, %cst {dimension_numbers = #tpu.dot_dimension_numbers<[1], [0], [0], [1], [0, 0, 1, 1], [], []>} : vector<8x64xbf16>, vector<64x192xbf16>, vector<8x192xf32> -> vector<8x192xf32>
    %13 = vector.broadcast %4 : vector<1x192xf32> to vector<8x192xf32>
    %14 = arith.addf %12, %13 : vector<8x192xf32>
    %15 = vector.extract_strided_slice %14 {offsets = [0, 0], sizes = [8, 64], strides = [1, 1]} : vector<8x192xf32> to vector<8x64xf32>
    %cst_16 = arith.constant 1.250000e-01 : f32
    %16 = vector.broadcast %cst_16 : f32 to vector<8x64xf32>
    %17 = arith.mulf %15, %16 : vector<8x64xf32>
    %18 = vector.extract_strided_slice %14 {offsets = [0, 64], sizes = [8, 64], strides = [1, 1]} : vector<8x192xf32> to vector<8x64xf32>
    %19 = vector.extract_strided_slice %14 {offsets = [0, 128], sizes = [8, 64], strides = [1, 1]} : vector<8x192xf32> to vector<8x64xf32>
    %20 = arith.truncf %17 : vector<8x64xf32> to vector<8x64xbf16>
    %21 = arith.truncf %18 : vector<8x64xf32> to vector<8x64xbf16>
    %cst_17 = arith.constant dense<0.000000e+00> : vector<8x8xf32>
    %22 = tpu.matmul %20, %21, %cst_17 {dimension_numbers = #tpu.dot_dimension_numbers<[1], [1], [0], [0], [0, 0, 1, 0], [], []>} : vector<8x64xbf16>, vector<8x64xbf16>, vector<8x8xf32> -> vector<8x8xf32>
    %23 = vector.extract_strided_slice %2 {offsets = [0, 0, 0], sizes = [1, 8, 1], strides = [1, 1, 1]} : vector<2x8x1xf32> to vector<1x8x1xf32>
    %24 = vector.shape_cast %23 : vector<1x8x1xf32> to vector<8x1xf32>
    %cst_18 = arith.constant 0.000000e+00 : f32
    %25 = vector.broadcast %cst_18 : f32 to vector<8x1xf32>
    %26 = arith.cmpf ogt, %24, %25 : vector<8x1xf32>
    %27 = vector.extract_strided_slice %1 {offsets = [0, 0, 0], sizes = [1, 1, 8], strides = [1, 1, 1]} : vector<2x1x8xf32> to vector<1x1x8xf32>
    %28 = vector.shape_cast %27 : vector<1x1x8xf32> to vector<1x8xf32>
    %cst_19 = arith.constant 0.000000e+00 : f32
    %29 = vector.broadcast %cst_19 : f32 to vector<1x8xf32>
    %30 = arith.cmpf ogt, %28, %29 : vector<1x8xf32>
    %31 = vector.broadcast %26 : vector<8x1xi1> to vector<8x8xi1>
    %32 = vector.broadcast %30 : vector<1x8xi1> to vector<8x8xi1>
    %33 = arith.andi %31, %32 : vector<8x8xi1>
    %34 = arith.ori %33, %9 : vector<8x8xi1>
    %cst_20 = arith.constant -1.000000e+30 : f32
    %35 = vector.broadcast %cst_20 : f32 to vector<8x8xf32>
    %36 = arith.select %34, %22, %35 : vector<8x8xi1>, vector<8x8xf32>
    %cst_21 = arith.constant dense<0xFF800000> : vector<8xf32>
    %37 = vector.multi_reduction <maximumf>, %36, %cst_21 [1] : vector<8x8xf32> to vector<8xf32>
    %38 = vector.shape_cast %37 : vector<8xf32> to vector<8x1xf32>
    %39 = vector.broadcast %38 : vector<8x1xf32> to vector<8x8xf32>
    %40 = arith.subf %36, %39 : vector<8x8xf32>
    %41 = math.exp %40 : vector<8x8xf32>
    %cst_22 = arith.constant dense<0.000000e+00> : vector<8xf32>
    %42 = vector.multi_reduction <add>, %41, %cst_22 [1] : vector<8x8xf32> to vector<8xf32>
    %43 = vector.shape_cast %42 : vector<8xf32> to vector<8x1xf32>
    %44 = tpu.reciprocal %43 {approx = true} : vector<8x1xf32> -> vector<8x1xf32>
    %45 = vector.broadcast %44 : vector<8x1xf32> to vector<8x8xf32>
    %46 = arith.mulf %41, %45 : vector<8x8xf32>
    %47 = arith.truncf %46 : vector<8x8xf32> to vector<8x8xbf16>
    %48 = arith.truncf %19 : vector<8x64xf32> to vector<8x64xbf16>
    %cst_23 = arith.constant dense<0.000000e+00> : vector<8x64xf32>
    %49 = tpu.matmul %47, %48, %cst_23 {dimension_numbers = #tpu.dot_dimension_numbers<[1], [0], [0], [1], [0, 0, 1, 1], [], []>} : vector<8x8xbf16>, vector<8x64xbf16>, vector<8x64xf32> -> vector<8x64xf32>
    %50 = arith.truncf %49 : vector<8x64xf32> to vector<8x64xbf16>
    %cst_24 = arith.constant dense<0.000000e+00> : vector<8x64xf32>
    %51 = tpu.matmul %50, %5, %cst_24 {dimension_numbers = #tpu.dot_dimension_numbers<[1], [0], [0], [1], [0, 0, 1, 1], [], []>} : vector<8x64xbf16>, vector<64x64xbf16>, vector<8x64xf32> -> vector<8x64xf32>
    %52 = vector.broadcast %6 : vector<1x64xf32> to vector<8x64xf32>
    %53 = arith.addf %51, %52 : vector<8x64xf32>
    %c0_25 = arith.constant 0 : index
    %c0_26 = arith.constant 0 : index
    %c0_27 = arith.constant 0 : index
    %54 = vector.load %arg7[%c0_25, %c0_26, %c0_27] : memref<2x8x64xf32, #tpu.memory_space<vmem>>, vector<1x8x64xf32>
    %55 = vector.shape_cast %54 : vector<1x8x64xf32> to vector<8x64xf32>
    %56 = vector.shape_cast %53 : vector<8x64xf32> to vector<1x8x64xf32>
    tpu.vector_store %arg7[%c0_25, %c0_26, %c0_27], %56 {strides = array<i32>} : memref<2x8x64xf32, #tpu.memory_space<vmem>>, vector<1x8x64xf32>,
    %57 = vector.extract_strided_slice %0 {offsets = [1, 0, 0], sizes = [1, 8, 64], strides = [1, 1, 1]} : vector<2x8x64xbf16> to vector<1x8x64xbf16>
    %58 = vector.shape_cast %57 : vector<1x8x64xbf16> to vector<8x64xbf16>
    %cst_28 = arith.constant dense<0.000000e+00> : vector<8x192xf32>
    %59 = tpu.matmul %58, %3, %cst_28 {dimension_numbers = #tpu.dot_dimension_numbers<[1], [0], [0], [1], [0, 0, 1, 1], [], []>} : vector<8x64xbf16>, vector<64x192xbf16>, vector<8x192xf32> -> vector<8x192xf32>
    %60 = vector.broadcast %4 : vector<1x192xf32> to vector<8x192xf32>
    %61 = arith.addf %59, %60 : vector<8x192xf32>
    %62 = vector.extract_strided_slice %61 {offsets = [0, 0], sizes = [8, 64], strides = [1, 1]} : vector<8x192xf32> to vector<8x64xf32>
    %cst_29 = arith.constant 1.250000e-01 : f32
    %63 = vector.broadcast %cst_29 : f32 to vector<8x64xf32>
    %64 = arith.mulf %62, %63 : vector<8x64xf32>
    %65 = vector.extract_strided_slice %61 {offsets = [0, 64], sizes = [8, 64], strides = [1, 1]} : vector<8x192xf32> to vector<8x64xf32>
    %66 = vector.extract_strided_slice %61 {offsets = [0, 128], sizes = [8, 64], strides = [1, 1]} : vector<8x192xf32> to vector<8x64xf32>
    %67 = arith.truncf %64 : vector<8x64xf32> to vector<8x64xbf16>
    %68 = arith.truncf %65 : vector<8x64xf32> to vector<8x64xbf16>
    %cst_30 = arith.constant dense<0.000000e+00> : vector<8x8xf32>
    %69 = tpu.matmul %67, %68, %cst_30 {dimension_numbers = #tpu.dot_dimension_numbers<[1], [1], [0], [0], [0, 0, 1, 0], [], []>} : vector<8x64xbf16>, vector<8x64xbf16>, vector<8x8xf32> -> vector<8x8xf32>
    %70 = vector.extract_strided_slice %2 {offsets = [1, 0, 0], sizes = [1, 8, 1], strides = [1, 1, 1]} : vector<2x8x1xf32> to vector<1x8x1xf32>
    %71 = vector.shape_cast %70 : vector<1x8x1xf32> to vector<8x1xf32>
    %cst_31 = arith.constant 0.000000e+00 : f32
    %72 = vector.broadcast %cst_31 : f32 to vector<8x1xf32>
    %73 = arith.cmpf ogt, %71, %72 : vector<8x1xf32>
    %74 = vector.extract_strided_slice %1 {offsets = [1, 0, 0], sizes = [1, 1, 8], strides = [1, 1, 1]} : vector<2x1x8xf32> to vector<1x1x8xf32>
    %75 = vector.shape_cast %74 : vector<1x1x8xf32> to vector<1x8xf32>
    %cst_32 = arith.constant 0.000000e+00 : f32
    %76 = vector.broadcast %cst_32 : f32 to vector<1x8xf32>
    %77 = arith.cmpf ogt, %75, %76 : vector<1x8xf32>
    %78 = vector.broadcast %73 : vector<8x1xi1> to vector<8x8xi1>
    %79 = vector.broadcast %77 : vector<1x8xi1> to vector<8x8xi1>
    %80 = arith.andi %78, %79 : vector<8x8xi1>
    %81 = arith.ori %80, %9 : vector<8x8xi1>
    %cst_33 = arith.constant -1.000000e+30 : f32
    %82 = vector.broadcast %cst_33 : f32 to vector<8x8xf32>
    %83 = arith.select %81, %69, %82 : vector<8x8xi1>, vector<8x8xf32>
    %cst_34 = arith.constant dense<0xFF800000> : vector<8xf32>
    %84 = vector.multi_reduction <maximumf>, %83, %cst_34 [1] : vector<8x8xf32> to vector<8xf32>
    %85 = vector.shape_cast %84 : vector<8xf32> to vector<8x1xf32>
    %86 = vector.broadcast %85 : vector<8x1xf32> to vector<8x8xf32>
    %87 = arith.subf %83, %86 : vector<8x8xf32>
    %88 = math.exp %87 : vector<8x8xf32>
    %cst_35 = arith.constant dense<0.000000e+00> : vector<8xf32>
    %89 = vector.multi_reduction <add>, %88, %cst_35 [1] : vector<8x8xf32> to vector<8xf32>
    %90 = vector.shape_cast %89 : vector<8xf32> to vector<8x1xf32>
    %91 = tpu.reciprocal %90 {approx = true} : vector<8x1xf32> -> vector<8x1xf32>
    %92 = vector.broadcast %91 : vector<8x1xf32> to vector<8x8xf32>
    %93 = arith.mulf %88, %92 : vector<8x8xf32>
    %94 = arith.truncf %93 : vector<8x8xf32> to vector<8x8xbf16>
    %95 = arith.truncf %66 : vector<8x64xf32> to vector<8x64xbf16>
    %cst_36 = arith.constant dense<0.000000e+00> : vector<8x64xf32>
    %96 = tpu.matmul %94, %95, %cst_36 {dimension_numbers = #tpu.dot_dimension_numbers<[1], [0], [0], [1], [0, 0, 1, 1], [], []>} : vector<8x8xbf16>, vector<8x64xbf16>, vector<8x64xf32> -> vector<8x64xf32>
    %97 = arith.truncf %96 : vector<8x64xf32> to vector<8x64xbf16>
    %cst_37 = arith.constant dense<0.000000e+00> : vector<8x64xf32>
    %98 = tpu.matmul %97, %5, %cst_37 {dimension_numbers = #tpu.dot_dimension_numbers<[1], [0], [0], [1], [0, 0, 1, 1], [], []>} : vector<8x64xbf16>, vector<64x64xbf16>, vector<8x64xf32> -> vector<8x64xf32>
    %99 = vector.broadcast %6 : vector<1x64xf32> to vector<8x64xf32>
    %100 = arith.addf %98, %99 : vector<8x64xf32>
    %c1 = arith.constant 1 : index
    %c0_38 = arith.constant 0 : index
    %c0_39 = arith.constant 0 : index
    %101 = vector.load %arg7[%c1, %c0_38, %c0_39] : memref<2x8x64xf32, #tpu.memory_space<vmem>>, vector<1x8x64xf32>
    %102 = vector.shape_cast %101 : vector<1x8x64xf32> to vector<8x64xf32>
    %103 = vector.shape_cast %100 : vector<8x64xf32> to vector<1x8x64xf32>
    tpu.vector_store %arg7[%c1, %c0_38, %c0_39], %103 {strides = array<i32>} : memref<2x8x64xf32, #tpu.memory_space<vmem>>, vector<1x8x64xf32>,
    return
  }
}

module attributes {stable_mosaic.version = 11 : i64} {
  func.func @bilstm_kernel(%arg0: memref<16x32xbf16, #tpu.memory_space<vmem>>, %arg1: memref<32x256xbf16, #tpu.memory_space<vmem>>, %arg2: memref<64x256xbf16, #tpu.memory_space<vmem>>, %arg3: memref<1x256xf32, #tpu.memory_space<vmem>>, %arg4: memref<2x64xf32, #tpu.memory_space<vmem>>, %arg5: memref<2x64xf32, #tpu.memory_space<vmem>>, %arg6: memref<2x8x64xbf16, #tpu.memory_space<vmem>>, %arg7: memref<2x2x32xf32, #tpu.memory_space<vmem>>, %arg8: memref<2x2x32xf32, #tpu.memory_space<vmem>>, %arg9: memref<8x2x256xf32, #tpu.memory_space<vmem>>, %arg10: memref<8x2x64xf32, #tpu.memory_space<vmem>>) attributes {dimension_semantics = [], scalar_prefetch = 0 : i64, scratch_operands = 2 : i64, tpu.core_type = #tpu.core_type<tc>} {
    %c0 = arith.constant 0 : index
    %c0_0 = arith.constant 0 : index
    %0 = vector.load %arg0[%c0, %c0_0] : memref<16x32xbf16, #tpu.memory_space<vmem>>, vector<16x32xbf16>
    %c0_1 = arith.constant 0 : index
    %c0_2 = arith.constant 0 : index
    %1 = vector.load %arg1[%c0_1, %c0_2] : memref<32x256xbf16, #tpu.memory_space<vmem>>, vector<32x256xbf16>
    %cst = arith.constant dense<0.000000e+00> : vector<16x256xf32>
    %2 = tpu.matmul %0, %1, %cst {dimension_numbers = #tpu.dot_dimension_numbers<[1], [0], [0], [1], [0, 0, 1, 1], [], []>} : vector<16x32xbf16>, vector<32x256xbf16>, vector<16x256xf32> -> vector<16x256xf32>
    %c0_3 = arith.constant 0 : index
    %c0_4 = arith.constant 0 : index
    %3 = vector.load %arg3[%c0_3, %c0_4] : memref<1x256xf32, #tpu.memory_space<vmem>>, vector<1x256xf32>
    %4 = vector.broadcast %3 : vector<1x256xf32> to vector<16x256xf32>
    %5 = arith.addf %2, %4 : vector<16x256xf32>
    %6 = vector.extract_strided_slice %5 {offsets = [0, 0], sizes = [2, 256], strides = [1, 1]} : vector<16x256xf32> to vector<2x256xf32>
    %c0_5 = arith.constant 0 : index
    %c0_6 = arith.constant 0 : index
    %c0_7 = arith.constant 0 : index
    %7 = vector.load %arg9[%c0_5, %c0_6, %c0_7] : memref<8x2x256xf32, #tpu.memory_space<vmem>>, vector<1x2x256xf32>
    %8 = vector.shape_cast %7 : vector<1x2x256xf32> to vector<2x256xf32>
    %9 = vector.shape_cast %6 : vector<2x256xf32> to vector<1x2x256xf32>
    tpu.vector_store %arg9[%c0_5, %c0_6, %c0_7], %9 {strides = array<i32>} : memref<8x2x256xf32, #tpu.memory_space<vmem>>, vector<1x2x256xf32>,
    %10 = vector.extract_strided_slice %5 {offsets = [2, 0], sizes = [2, 256], strides = [1, 1]} : vector<16x256xf32> to vector<2x256xf32>
    %c1 = arith.constant 1 : index
    %c0_8 = arith.constant 0 : index
    %c0_9 = arith.constant 0 : index
    %11 = vector.load %arg9[%c1, %c0_8, %c0_9] : memref<8x2x256xf32, #tpu.memory_space<vmem>>, vector<1x2x256xf32>
    %12 = vector.shape_cast %11 : vector<1x2x256xf32> to vector<2x256xf32>
    %13 = vector.shape_cast %10 : vector<2x256xf32> to vector<1x2x256xf32>
    tpu.vector_store %arg9[%c1, %c0_8, %c0_9], %13 {strides = array<i32>} : memref<8x2x256xf32, #tpu.memory_space<vmem>>, vector<1x2x256xf32>,
    %14 = vector.extract_strided_slice %5 {offsets = [4, 0], sizes = [2, 256], strides = [1, 1]} : vector<16x256xf32> to vector<2x256xf32>
    %c2 = arith.constant 2 : index
    %c0_10 = arith.constant 0 : index
    %c0_11 = arith.constant 0 : index
    %15 = vector.load %arg9[%c2, %c0_10, %c0_11] : memref<8x2x256xf32, #tpu.memory_space<vmem>>, vector<1x2x256xf32>
    %16 = vector.shape_cast %15 : vector<1x2x256xf32> to vector<2x256xf32>
    %17 = vector.shape_cast %14 : vector<2x256xf32> to vector<1x2x256xf32>
    tpu.vector_store %arg9[%c2, %c0_10, %c0_11], %17 {strides = array<i32>} : memref<8x2x256xf32, #tpu.memory_space<vmem>>, vector<1x2x256xf32>,
    %18 = vector.extract_strided_slice %5 {offsets = [6, 0], sizes = [2, 256], strides = [1, 1]} : vector<16x256xf32> to vector<2x256xf32>
    %c3 = arith.constant 3 : index
    %c0_12 = arith.constant 0 : index
    %c0_13 = arith.constant 0 : index
    %19 = vector.load %arg9[%c3, %c0_12, %c0_13] : memref<8x2x256xf32, #tpu.memory_space<vmem>>, vector<1x2x256xf32>
    %20 = vector.shape_cast %19 : vector<1x2x256xf32> to vector<2x256xf32>
    %21 = vector.shape_cast %18 : vector<2x256xf32> to vector<1x2x256xf32>
    tpu.vector_store %arg9[%c3, %c0_12, %c0_13], %21 {strides = array<i32>} : memref<8x2x256xf32, #tpu.memory_space<vmem>>, vector<1x2x256xf32>,
    %22 = vector.extract_strided_slice %5 {offsets = [8, 0], sizes = [2, 256], strides = [1, 1]} : vector<16x256xf32> to vector<2x256xf32>
    %c4 = arith.constant 4 : index
    %c0_14 = arith.constant 0 : index
    %c0_15 = arith.constant 0 : index
    %23 = vector.load %arg9[%c4, %c0_14, %c0_15] : memref<8x2x256xf32, #tpu.memory_space<vmem>>, vector<1x2x256xf32>
    %24 = vector.shape_cast %23 : vector<1x2x256xf32> to vector<2x256xf32>
    %25 = vector.shape_cast %22 : vector<2x256xf32> to vector<1x2x256xf32>
    tpu.vector_store %arg9[%c4, %c0_14, %c0_15], %25 {strides = array<i32>} : memref<8x2x256xf32, #tpu.memory_space<vmem>>, vector<1x2x256xf32>,
    %26 = vector.extract_strided_slice %5 {offsets = [10, 0], sizes = [2, 256], strides = [1, 1]} : vector<16x256xf32> to vector<2x256xf32>
    %c5 = arith.constant 5 : index
    %c0_16 = arith.constant 0 : index
    %c0_17 = arith.constant 0 : index
    %27 = vector.load %arg9[%c5, %c0_16, %c0_17] : memref<8x2x256xf32, #tpu.memory_space<vmem>>, vector<1x2x256xf32>
    %28 = vector.shape_cast %27 : vector<1x2x256xf32> to vector<2x256xf32>
    %29 = vector.shape_cast %26 : vector<2x256xf32> to vector<1x2x256xf32>
    tpu.vector_store %arg9[%c5, %c0_16, %c0_17], %29 {strides = array<i32>} : memref<8x2x256xf32, #tpu.memory_space<vmem>>, vector<1x2x256xf32>,
    %30 = vector.extract_strided_slice %5 {offsets = [12, 0], sizes = [2, 256], strides = [1, 1]} : vector<16x256xf32> to vector<2x256xf32>
    %c6 = arith.constant 6 : index
    %c0_18 = arith.constant 0 : index
    %c0_19 = arith.constant 0 : index
    %31 = vector.load %arg9[%c6, %c0_18, %c0_19] : memref<8x2x256xf32, #tpu.memory_space<vmem>>, vector<1x2x256xf32>
    %32 = vector.shape_cast %31 : vector<1x2x256xf32> to vector<2x256xf32>
    %33 = vector.shape_cast %30 : vector<2x256xf32> to vector<1x2x256xf32>
    tpu.vector_store %arg9[%c6, %c0_18, %c0_19], %33 {strides = array<i32>} : memref<8x2x256xf32, #tpu.memory_space<vmem>>, vector<1x2x256xf32>,
    %34 = vector.extract_strided_slice %5 {offsets = [14, 0], sizes = [2, 256], strides = [1, 1]} : vector<16x256xf32> to vector<2x256xf32>
    %c7 = arith.constant 7 : index
    %c0_20 = arith.constant 0 : index
    %c0_21 = arith.constant 0 : index
    %35 = vector.load %arg9[%c7, %c0_20, %c0_21] : memref<8x2x256xf32, #tpu.memory_space<vmem>>, vector<1x2x256xf32>
    %36 = vector.shape_cast %35 : vector<1x2x256xf32> to vector<2x256xf32>
    %37 = vector.shape_cast %34 : vector<2x256xf32> to vector<1x2x256xf32>
    tpu.vector_store %arg9[%c7, %c0_20, %c0_21], %37 {strides = array<i32>} : memref<8x2x256xf32, #tpu.memory_space<vmem>>, vector<1x2x256xf32>,
    %c0_22 = arith.constant 0 : index
    %c0_23 = arith.constant 0 : index
    %38 = vector.load %arg2[%c0_22, %c0_23] : memref<64x256xbf16, #tpu.memory_space<vmem>>, vector<64x256xbf16>
    %c0_24 = arith.constant 0 : index
    %c0_25 = arith.constant 0 : index
    %39 = vector.load %arg4[%c0_24, %c0_25] : memref<2x64xf32, #tpu.memory_space<vmem>>, vector<2x64xf32>
    %c0_26 = arith.constant 0 : index
    %c0_27 = arith.constant 0 : index
    %40 = vector.load %arg5[%c0_26, %c0_27] : memref<2x64xf32, #tpu.memory_space<vmem>>, vector<2x64xf32>
    %c0_i32 = arith.constant 0 : i32
    %41 = arith.index_cast %c0_i32 : i32 to index
    %c0_28 = arith.constant 0 : index
    %c0_29 = arith.constant 0 : index
    %42 = vector.load %arg9[%41, %c0_28, %c0_29] : memref<8x2x256xf32, #tpu.memory_space<vmem>>, vector<1x2x256xf32>
    %43 = vector.shape_cast %42 : vector<1x2x256xf32> to vector<2x256xf32>
    %44 = arith.truncf %39 : vector<2x64xf32> to vector<2x64xbf16>
    %cst_30 = arith.constant dense<0.000000e+00> : vector<2x256xf32>
    %45 = tpu.matmul %44, %38, %cst_30 {dimension_numbers = #tpu.dot_dimension_numbers<[1], [0], [0], [1], [0, 0, 1, 1], [], []>} : vector<2x64xbf16>, vector<64x256xbf16>, vector<2x256xf32> -> vector<2x256xf32>
    %46 = arith.addf %43, %45 : vector<2x256xf32>
    %47 = vector.extract_strided_slice %46 {offsets = [0, 0], sizes = [2, 64], strides = [1, 1]} : vector<2x256xf32> to vector<2x64xf32>
    %48 = arith.negf %47 : vector<2x64xf32>
    %49 = math.exp %48 : vector<2x64xf32>
    %cst_31 = arith.constant 1.000000e+00 : f32
    %50 = vector.broadcast %cst_31 : f32 to vector<2x64xf32>
    %51 = arith.addf %50, %49 : vector<2x64xf32>
    %52 = arith.divf %50, %51 : vector<2x64xf32>
    %53 = vector.extract_strided_slice %46 {offsets = [0, 64], sizes = [2, 64], strides = [1, 1]} : vector<2x256xf32> to vector<2x64xf32>
    %54 = arith.negf %53 : vector<2x64xf32>
    %55 = math.exp %54 : vector<2x64xf32>
    %cst_32 = arith.constant 1.000000e+00 : f32
    %56 = vector.broadcast %cst_32 : f32 to vector<2x64xf32>
    %57 = arith.addf %56, %55 : vector<2x64xf32>
    %58 = arith.divf %56, %57 : vector<2x64xf32>
    %59 = vector.extract_strided_slice %46 {offsets = [0, 128], sizes = [2, 64], strides = [1, 1]} : vector<2x256xf32> to vector<2x64xf32>
    %60 = math.tanh %59 : vector<2x64xf32>
    %61 = vector.extract_strided_slice %46 {offsets = [0, 192], sizes = [2, 64], strides = [1, 1]} : vector<2x256xf32> to vector<2x64xf32>
    %62 = arith.negf %61 : vector<2x64xf32>
    %63 = math.exp %62 : vector<2x64xf32>
    %cst_33 = arith.constant 1.000000e+00 : f32
    %64 = vector.broadcast %cst_33 : f32 to vector<2x64xf32>
    %65 = arith.addf %64, %63 : vector<2x64xf32>
    %66 = arith.divf %64, %65 : vector<2x64xf32>
    %67 = arith.mulf %58, %40 : vector<2x64xf32>
    %68 = arith.mulf %52, %60 : vector<2x64xf32>
    %69 = arith.addf %67, %68 : vector<2x64xf32>
    %70 = math.tanh %69 : vector<2x64xf32>
    %71 = arith.mulf %66, %70 : vector<2x64xf32>
    %72 = arith.index_cast %c0_i32 : i32 to index
    %c0_34 = arith.constant 0 : index
    %c0_35 = arith.constant 0 : index
    %73 = vector.load %arg10[%72, %c0_34, %c0_35] : memref<8x2x64xf32, #tpu.memory_space<vmem>>, vector<1x2x64xf32>
    %74 = vector.shape_cast %73 : vector<1x2x64xf32> to vector<2x64xf32>
    %75 = vector.shape_cast %71 : vector<2x64xf32> to vector<1x2x64xf32>
    tpu.vector_store %arg10[%72, %c0_34, %c0_35], %75 {strides = array<i32>} : memref<8x2x64xf32, #tpu.memory_space<vmem>>, vector<1x2x64xf32>,
    %c1_i32 = arith.constant 1 : i32
    %76 = arith.index_cast %c1_i32 : i32 to index
    %c0_36 = arith.constant 0 : index
    %c0_37 = arith.constant 0 : index
    %77 = vector.load %arg9[%76, %c0_36, %c0_37] : memref<8x2x256xf32, #tpu.memory_space<vmem>>, vector<1x2x256xf32>
    %78 = vector.shape_cast %77 : vector<1x2x256xf32> to vector<2x256xf32>
    %79 = arith.truncf %71 : vector<2x64xf32> to vector<2x64xbf16>
    %cst_38 = arith.constant dense<0.000000e+00> : vector<2x256xf32>
    %80 = tpu.matmul %79, %38, %cst_38 {dimension_numbers = #tpu.dot_dimension_numbers<[1], [0], [0], [1], [0, 0, 1, 1], [], []>} : vector<2x64xbf16>, vector<64x256xbf16>, vector<2x256xf32> -> vector<2x256xf32>
    %81 = arith.addf %78, %80 : vector<2x256xf32>
    %82 = vector.extract_strided_slice %81 {offsets = [0, 0], sizes = [2, 64], strides = [1, 1]} : vector<2x256xf32> to vector<2x64xf32>
    %83 = arith.negf %82 : vector<2x64xf32>
    %84 = math.exp %83 : vector<2x64xf32>
    %cst_39 = arith.constant 1.000000e+00 : f32
    %85 = vector.broadcast %cst_39 : f32 to vector<2x64xf32>
    %86 = arith.addf %85, %84 : vector<2x64xf32>
    %87 = arith.divf %85, %86 : vector<2x64xf32>
    %88 = vector.extract_strided_slice %81 {offsets = [0, 64], sizes = [2, 64], strides = [1, 1]} : vector<2x256xf32> to vector<2x64xf32>
    %89 = arith.negf %88 : vector<2x64xf32>
    %90 = math.exp %89 : vector<2x64xf32>
    %cst_40 = arith.constant 1.000000e+00 : f32
    %91 = vector.broadcast %cst_40 : f32 to vector<2x64xf32>
    %92 = arith.addf %91, %90 : vector<2x64xf32>
    %93 = arith.divf %91, %92 : vector<2x64xf32>
    %94 = vector.extract_strided_slice %81 {offsets = [0, 128], sizes = [2, 64], strides = [1, 1]} : vector<2x256xf32> to vector<2x64xf32>
    %95 = math.tanh %94 : vector<2x64xf32>
    %96 = vector.extract_strided_slice %81 {offsets = [0, 192], sizes = [2, 64], strides = [1, 1]} : vector<2x256xf32> to vector<2x64xf32>
    %97 = arith.negf %96 : vector<2x64xf32>
    %98 = math.exp %97 : vector<2x64xf32>
    %cst_41 = arith.constant 1.000000e+00 : f32
    %99 = vector.broadcast %cst_41 : f32 to vector<2x64xf32>
    %100 = arith.addf %99, %98 : vector<2x64xf32>
    %101 = arith.divf %99, %100 : vector<2x64xf32>
    %102 = arith.mulf %93, %69 : vector<2x64xf32>
    %103 = arith.mulf %87, %95 : vector<2x64xf32>
    %104 = arith.addf %102, %103 : vector<2x64xf32>
    %105 = math.tanh %104 : vector<2x64xf32>
    %106 = arith.mulf %101, %105 : vector<2x64xf32>
    %107 = arith.index_cast %c1_i32 : i32 to index
    %c0_42 = arith.constant 0 : index
    %c0_43 = arith.constant 0 : index
    %108 = vector.load %arg10[%107, %c0_42, %c0_43] : memref<8x2x64xf32, #tpu.memory_space<vmem>>, vector<1x2x64xf32>
    %109 = vector.shape_cast %108 : vector<1x2x64xf32> to vector<2x64xf32>
    %110 = vector.shape_cast %106 : vector<2x64xf32> to vector<1x2x64xf32>
    tpu.vector_store %arg10[%107, %c0_42, %c0_43], %110 {strides = array<i32>} : memref<8x2x64xf32, #tpu.memory_space<vmem>>, vector<1x2x64xf32>,
    %c2_i32 = arith.constant 2 : i32
    %111 = arith.index_cast %c2_i32 : i32 to index
    %c0_44 = arith.constant 0 : index
    %c0_45 = arith.constant 0 : index
    %112 = vector.load %arg9[%111, %c0_44, %c0_45] : memref<8x2x256xf32, #tpu.memory_space<vmem>>, vector<1x2x256xf32>
    %113 = vector.shape_cast %112 : vector<1x2x256xf32> to vector<2x256xf32>
    %114 = arith.truncf %106 : vector<2x64xf32> to vector<2x64xbf16>
    %cst_46 = arith.constant dense<0.000000e+00> : vector<2x256xf32>
    %115 = tpu.matmul %114, %38, %cst_46 {dimension_numbers = #tpu.dot_dimension_numbers<[1], [0], [0], [1], [0, 0, 1, 1], [], []>} : vector<2x64xbf16>, vector<64x256xbf16>, vector<2x256xf32> -> vector<2x256xf32>
    %116 = arith.addf %113, %115 : vector<2x256xf32>
    %117 = vector.extract_strided_slice %116 {offsets = [0, 0], sizes = [2, 64], strides = [1, 1]} : vector<2x256xf32> to vector<2x64xf32>
    %118 = arith.negf %117 : vector<2x64xf32>
    %119 = math.exp %118 : vector<2x64xf32>
    %cst_47 = arith.constant 1.000000e+00 : f32
    %120 = vector.broadcast %cst_47 : f32 to vector<2x64xf32>
    %121 = arith.addf %120, %119 : vector<2x64xf32>
    %122 = arith.divf %120, %121 : vector<2x64xf32>
    %123 = vector.extract_strided_slice %116 {offsets = [0, 64], sizes = [2, 64], strides = [1, 1]} : vector<2x256xf32> to vector<2x64xf32>
    %124 = arith.negf %123 : vector<2x64xf32>
    %125 = math.exp %124 : vector<2x64xf32>
    %cst_48 = arith.constant 1.000000e+00 : f32
    %126 = vector.broadcast %cst_48 : f32 to vector<2x64xf32>
    %127 = arith.addf %126, %125 : vector<2x64xf32>
    %128 = arith.divf %126, %127 : vector<2x64xf32>
    %129 = vector.extract_strided_slice %116 {offsets = [0, 128], sizes = [2, 64], strides = [1, 1]} : vector<2x256xf32> to vector<2x64xf32>
    %130 = math.tanh %129 : vector<2x64xf32>
    %131 = vector.extract_strided_slice %116 {offsets = [0, 192], sizes = [2, 64], strides = [1, 1]} : vector<2x256xf32> to vector<2x64xf32>
    %132 = arith.negf %131 : vector<2x64xf32>
    %133 = math.exp %132 : vector<2x64xf32>
    %cst_49 = arith.constant 1.000000e+00 : f32
    %134 = vector.broadcast %cst_49 : f32 to vector<2x64xf32>
    %135 = arith.addf %134, %133 : vector<2x64xf32>
    %136 = arith.divf %134, %135 : vector<2x64xf32>
    %137 = arith.mulf %128, %104 : vector<2x64xf32>
    %138 = arith.mulf %122, %130 : vector<2x64xf32>
    %139 = arith.addf %137, %138 : vector<2x64xf32>
    %140 = math.tanh %139 : vector<2x64xf32>
    %141 = arith.mulf %136, %140 : vector<2x64xf32>
    %142 = arith.index_cast %c2_i32 : i32 to index
    %c0_50 = arith.constant 0 : index
    %c0_51 = arith.constant 0 : index
    %143 = vector.load %arg10[%142, %c0_50, %c0_51] : memref<8x2x64xf32, #tpu.memory_space<vmem>>, vector<1x2x64xf32>
    %144 = vector.shape_cast %143 : vector<1x2x64xf32> to vector<2x64xf32>
    %145 = vector.shape_cast %141 : vector<2x64xf32> to vector<1x2x64xf32>
    tpu.vector_store %arg10[%142, %c0_50, %c0_51], %145 {strides = array<i32>} : memref<8x2x64xf32, #tpu.memory_space<vmem>>, vector<1x2x64xf32>,
    %c3_i32 = arith.constant 3 : i32
    %146 = arith.index_cast %c3_i32 : i32 to index
    %c0_52 = arith.constant 0 : index
    %c0_53 = arith.constant 0 : index
    %147 = vector.load %arg9[%146, %c0_52, %c0_53] : memref<8x2x256xf32, #tpu.memory_space<vmem>>, vector<1x2x256xf32>
    %148 = vector.shape_cast %147 : vector<1x2x256xf32> to vector<2x256xf32>
    %149 = arith.truncf %141 : vector<2x64xf32> to vector<2x64xbf16>
    %cst_54 = arith.constant dense<0.000000e+00> : vector<2x256xf32>
    %150 = tpu.matmul %149, %38, %cst_54 {dimension_numbers = #tpu.dot_dimension_numbers<[1], [0], [0], [1], [0, 0, 1, 1], [], []>} : vector<2x64xbf16>, vector<64x256xbf16>, vector<2x256xf32> -> vector<2x256xf32>
    %151 = arith.addf %148, %150 : vector<2x256xf32>
    %152 = vector.extract_strided_slice %151 {offsets = [0, 0], sizes = [2, 64], strides = [1, 1]} : vector<2x256xf32> to vector<2x64xf32>
    %153 = arith.negf %152 : vector<2x64xf32>
    %154 = math.exp %153 : vector<2x64xf32>
    %cst_55 = arith.constant 1.000000e+00 : f32
    %155 = vector.broadcast %cst_55 : f32 to vector<2x64xf32>
    %156 = arith.addf %155, %154 : vector<2x64xf32>
    %157 = arith.divf %155, %156 : vector<2x64xf32>
    %158 = vector.extract_strided_slice %151 {offsets = [0, 64], sizes = [2, 64], strides = [1, 1]} : vector<2x256xf32> to vector<2x64xf32>
    %159 = arith.negf %158 : vector<2x64xf32>
    %160 = math.exp %159 : vector<2x64xf32>
    %cst_56 = arith.constant 1.000000e+00 : f32
    %161 = vector.broadcast %cst_56 : f32 to vector<2x64xf32>
    %162 = arith.addf %161, %160 : vector<2x64xf32>
    %163 = arith.divf %161, %162 : vector<2x64xf32>
    %164 = vector.extract_strided_slice %151 {offsets = [0, 128], sizes = [2, 64], strides = [1, 1]} : vector<2x256xf32> to vector<2x64xf32>
    %165 = math.tanh %164 : vector<2x64xf32>
    %166 = vector.extract_strided_slice %151 {offsets = [0, 192], sizes = [2, 64], strides = [1, 1]} : vector<2x256xf32> to vector<2x64xf32>
    %167 = arith.negf %166 : vector<2x64xf32>
    %168 = math.exp %167 : vector<2x64xf32>
    %cst_57 = arith.constant 1.000000e+00 : f32
    %169 = vector.broadcast %cst_57 : f32 to vector<2x64xf32>
    %170 = arith.addf %169, %168 : vector<2x64xf32>
    %171 = arith.divf %169, %170 : vector<2x64xf32>
    %172 = arith.mulf %163, %139 : vector<2x64xf32>
    %173 = arith.mulf %157, %165 : vector<2x64xf32>
    %174 = arith.addf %172, %173 : vector<2x64xf32>
    %175 = math.tanh %174 : vector<2x64xf32>
    %176 = arith.mulf %171, %175 : vector<2x64xf32>
    %177 = arith.index_cast %c3_i32 : i32 to index
    %c0_58 = arith.constant 0 : index
    %c0_59 = arith.constant 0 : index
    %178 = vector.load %arg10[%177, %c0_58, %c0_59] : memref<8x2x64xf32, #tpu.memory_space<vmem>>, vector<1x2x64xf32>
    %179 = vector.shape_cast %178 : vector<1x2x64xf32> to vector<2x64xf32>
    %180 = vector.shape_cast %176 : vector<2x64xf32> to vector<1x2x64xf32>
    tpu.vector_store %arg10[%177, %c0_58, %c0_59], %180 {strides = array<i32>} : memref<8x2x64xf32, #tpu.memory_space<vmem>>, vector<1x2x64xf32>,
    %c4_i32 = arith.constant 4 : i32
    %181 = arith.index_cast %c4_i32 : i32 to index
    %c0_60 = arith.constant 0 : index
    %c0_61 = arith.constant 0 : index
    %182 = vector.load %arg9[%181, %c0_60, %c0_61] : memref<8x2x256xf32, #tpu.memory_space<vmem>>, vector<1x2x256xf32>
    %183 = vector.shape_cast %182 : vector<1x2x256xf32> to vector<2x256xf32>
    %184 = arith.truncf %176 : vector<2x64xf32> to vector<2x64xbf16>
    %cst_62 = arith.constant dense<0.000000e+00> : vector<2x256xf32>
    %185 = tpu.matmul %184, %38, %cst_62 {dimension_numbers = #tpu.dot_dimension_numbers<[1], [0], [0], [1], [0, 0, 1, 1], [], []>} : vector<2x64xbf16>, vector<64x256xbf16>, vector<2x256xf32> -> vector<2x256xf32>
    %186 = arith.addf %183, %185 : vector<2x256xf32>
    %187 = vector.extract_strided_slice %186 {offsets = [0, 0], sizes = [2, 64], strides = [1, 1]} : vector<2x256xf32> to vector<2x64xf32>
    %188 = arith.negf %187 : vector<2x64xf32>
    %189 = math.exp %188 : vector<2x64xf32>
    %cst_63 = arith.constant 1.000000e+00 : f32
    %190 = vector.broadcast %cst_63 : f32 to vector<2x64xf32>
    %191 = arith.addf %190, %189 : vector<2x64xf32>
    %192 = arith.divf %190, %191 : vector<2x64xf32>
    %193 = vector.extract_strided_slice %186 {offsets = [0, 64], sizes = [2, 64], strides = [1, 1]} : vector<2x256xf32> to vector<2x64xf32>
    %194 = arith.negf %193 : vector<2x64xf32>
    %195 = math.exp %194 : vector<2x64xf32>
    %cst_64 = arith.constant 1.000000e+00 : f32
    %196 = vector.broadcast %cst_64 : f32 to vector<2x64xf32>
    %197 = arith.addf %196, %195 : vector<2x64xf32>
    %198 = arith.divf %196, %197 : vector<2x64xf32>
    %199 = vector.extract_strided_slice %186 {offsets = [0, 128], sizes = [2, 64], strides = [1, 1]} : vector<2x256xf32> to vector<2x64xf32>
    %200 = math.tanh %199 : vector<2x64xf32>
    %201 = vector.extract_strided_slice %186 {offsets = [0, 192], sizes = [2, 64], strides = [1, 1]} : vector<2x256xf32> to vector<2x64xf32>
    %202 = arith.negf %201 : vector<2x64xf32>
    %203 = math.exp %202 : vector<2x64xf32>
    %cst_65 = arith.constant 1.000000e+00 : f32
    %204 = vector.broadcast %cst_65 : f32 to vector<2x64xf32>
    %205 = arith.addf %204, %203 : vector<2x64xf32>
    %206 = arith.divf %204, %205 : vector<2x64xf32>
    %207 = arith.mulf %198, %174 : vector<2x64xf32>
    %208 = arith.mulf %192, %200 : vector<2x64xf32>
    %209 = arith.addf %207, %208 : vector<2x64xf32>
    %210 = math.tanh %209 : vector<2x64xf32>
    %211 = arith.mulf %206, %210 : vector<2x64xf32>
    %212 = arith.index_cast %c4_i32 : i32 to index
    %c0_66 = arith.constant 0 : index
    %c0_67 = arith.constant 0 : index
    %213 = vector.load %arg10[%212, %c0_66, %c0_67] : memref<8x2x64xf32, #tpu.memory_space<vmem>>, vector<1x2x64xf32>
    %214 = vector.shape_cast %213 : vector<1x2x64xf32> to vector<2x64xf32>
    %215 = vector.shape_cast %211 : vector<2x64xf32> to vector<1x2x64xf32>
    tpu.vector_store %arg10[%212, %c0_66, %c0_67], %215 {strides = array<i32>} : memref<8x2x64xf32, #tpu.memory_space<vmem>>, vector<1x2x64xf32>,
    %c5_i32 = arith.constant 5 : i32
    %216 = arith.index_cast %c5_i32 : i32 to index
    %c0_68 = arith.constant 0 : index
    %c0_69 = arith.constant 0 : index
    %217 = vector.load %arg9[%216, %c0_68, %c0_69] : memref<8x2x256xf32, #tpu.memory_space<vmem>>, vector<1x2x256xf32>
    %218 = vector.shape_cast %217 : vector<1x2x256xf32> to vector<2x256xf32>
    %219 = arith.truncf %211 : vector<2x64xf32> to vector<2x64xbf16>
    %cst_70 = arith.constant dense<0.000000e+00> : vector<2x256xf32>
    %220 = tpu.matmul %219, %38, %cst_70 {dimension_numbers = #tpu.dot_dimension_numbers<[1], [0], [0], [1], [0, 0, 1, 1], [], []>} : vector<2x64xbf16>, vector<64x256xbf16>, vector<2x256xf32> -> vector<2x256xf32>
    %221 = arith.addf %218, %220 : vector<2x256xf32>
    %222 = vector.extract_strided_slice %221 {offsets = [0, 0], sizes = [2, 64], strides = [1, 1]} : vector<2x256xf32> to vector<2x64xf32>
    %223 = arith.negf %222 : vector<2x64xf32>
    %224 = math.exp %223 : vector<2x64xf32>
    %cst_71 = arith.constant 1.000000e+00 : f32
    %225 = vector.broadcast %cst_71 : f32 to vector<2x64xf32>
    %226 = arith.addf %225, %224 : vector<2x64xf32>
    %227 = arith.divf %225, %226 : vector<2x64xf32>
    %228 = vector.extract_strided_slice %221 {offsets = [0, 64], sizes = [2, 64], strides = [1, 1]} : vector<2x256xf32> to vector<2x64xf32>
    %229 = arith.negf %228 : vector<2x64xf32>
    %230 = math.exp %229 : vector<2x64xf32>
    %cst_72 = arith.constant 1.000000e+00 : f32
    %231 = vector.broadcast %cst_72 : f32 to vector<2x64xf32>
    %232 = arith.addf %231, %230 : vector<2x64xf32>
    %233 = arith.divf %231, %232 : vector<2x64xf32>
    %234 = vector.extract_strided_slice %221 {offsets = [0, 128], sizes = [2, 64], strides = [1, 1]} : vector<2x256xf32> to vector<2x64xf32>
    %235 = math.tanh %234 : vector<2x64xf32>
    %236 = vector.extract_strided_slice %221 {offsets = [0, 192], sizes = [2, 64], strides = [1, 1]} : vector<2x256xf32> to vector<2x64xf32>
    %237 = arith.negf %236 : vector<2x64xf32>
    %238 = math.exp %237 : vector<2x64xf32>
    %cst_73 = arith.constant 1.000000e+00 : f32
    %239 = vector.broadcast %cst_73 : f32 to vector<2x64xf32>
    %240 = arith.addf %239, %238 : vector<2x64xf32>
    %241 = arith.divf %239, %240 : vector<2x64xf32>
    %242 = arith.mulf %233, %209 : vector<2x64xf32>
    %243 = arith.mulf %227, %235 : vector<2x64xf32>
    %244 = arith.addf %242, %243 : vector<2x64xf32>
    %245 = math.tanh %244 : vector<2x64xf32>
    %246 = arith.mulf %241, %245 : vector<2x64xf32>
    %247 = arith.index_cast %c5_i32 : i32 to index
    %c0_74 = arith.constant 0 : index
    %c0_75 = arith.constant 0 : index
    %248 = vector.load %arg10[%247, %c0_74, %c0_75] : memref<8x2x64xf32, #tpu.memory_space<vmem>>, vector<1x2x64xf32>
    %249 = vector.shape_cast %248 : vector<1x2x64xf32> to vector<2x64xf32>
    %250 = vector.shape_cast %246 : vector<2x64xf32> to vector<1x2x64xf32>
    tpu.vector_store %arg10[%247, %c0_74, %c0_75], %250 {strides = array<i32>} : memref<8x2x64xf32, #tpu.memory_space<vmem>>, vector<1x2x64xf32>,
    %c6_i32 = arith.constant 6 : i32
    %251 = arith.index_cast %c6_i32 : i32 to index
    %c0_76 = arith.constant 0 : index
    %c0_77 = arith.constant 0 : index
    %252 = vector.load %arg9[%251, %c0_76, %c0_77] : memref<8x2x256xf32, #tpu.memory_space<vmem>>, vector<1x2x256xf32>
    %253 = vector.shape_cast %252 : vector<1x2x256xf32> to vector<2x256xf32>
    %254 = arith.truncf %246 : vector<2x64xf32> to vector<2x64xbf16>
    %cst_78 = arith.constant dense<0.000000e+00> : vector<2x256xf32>
    %255 = tpu.matmul %254, %38, %cst_78 {dimension_numbers = #tpu.dot_dimension_numbers<[1], [0], [0], [1], [0, 0, 1, 1], [], []>} : vector<2x64xbf16>, vector<64x256xbf16>, vector<2x256xf32> -> vector<2x256xf32>
    %256 = arith.addf %253, %255 : vector<2x256xf32>
    %257 = vector.extract_strided_slice %256 {offsets = [0, 0], sizes = [2, 64], strides = [1, 1]} : vector<2x256xf32> to vector<2x64xf32>
    %258 = arith.negf %257 : vector<2x64xf32>
    %259 = math.exp %258 : vector<2x64xf32>
    %cst_79 = arith.constant 1.000000e+00 : f32
    %260 = vector.broadcast %cst_79 : f32 to vector<2x64xf32>
    %261 = arith.addf %260, %259 : vector<2x64xf32>
    %262 = arith.divf %260, %261 : vector<2x64xf32>
    %263 = vector.extract_strided_slice %256 {offsets = [0, 64], sizes = [2, 64], strides = [1, 1]} : vector<2x256xf32> to vector<2x64xf32>
    %264 = arith.negf %263 : vector<2x64xf32>
    %265 = math.exp %264 : vector<2x64xf32>
    %cst_80 = arith.constant 1.000000e+00 : f32
    %266 = vector.broadcast %cst_80 : f32 to vector<2x64xf32>
    %267 = arith.addf %266, %265 : vector<2x64xf32>
    %268 = arith.divf %266, %267 : vector<2x64xf32>
    %269 = vector.extract_strided_slice %256 {offsets = [0, 128], sizes = [2, 64], strides = [1, 1]} : vector<2x256xf32> to vector<2x64xf32>
    %270 = math.tanh %269 : vector<2x64xf32>
    %271 = vector.extract_strided_slice %256 {offsets = [0, 192], sizes = [2, 64], strides = [1, 1]} : vector<2x256xf32> to vector<2x64xf32>
    %272 = arith.negf %271 : vector<2x64xf32>
    %273 = math.exp %272 : vector<2x64xf32>
    %cst_81 = arith.constant 1.000000e+00 : f32
    %274 = vector.broadcast %cst_81 : f32 to vector<2x64xf32>
    %275 = arith.addf %274, %273 : vector<2x64xf32>
    %276 = arith.divf %274, %275 : vector<2x64xf32>
    %277 = arith.mulf %268, %244 : vector<2x64xf32>
    %278 = arith.mulf %262, %270 : vector<2x64xf32>
    %279 = arith.addf %277, %278 : vector<2x64xf32>
    %280 = math.tanh %279 : vector<2x64xf32>
    %281 = arith.mulf %276, %280 : vector<2x64xf32>
    %282 = arith.index_cast %c6_i32 : i32 to index
    %c0_82 = arith.constant 0 : index
    %c0_83 = arith.constant 0 : index
    %283 = vector.load %arg10[%282, %c0_82, %c0_83] : memref<8x2x64xf32, #tpu.memory_space<vmem>>, vector<1x2x64xf32>
    %284 = vector.shape_cast %283 : vector<1x2x64xf32> to vector<2x64xf32>
    %285 = vector.shape_cast %281 : vector<2x64xf32> to vector<1x2x64xf32>
    tpu.vector_store %arg10[%282, %c0_82, %c0_83], %285 {strides = array<i32>} : memref<8x2x64xf32, #tpu.memory_space<vmem>>, vector<1x2x64xf32>,
    %c7_i32 = arith.constant 7 : i32
    %286 = arith.index_cast %c7_i32 : i32 to index
    %c0_84 = arith.constant 0 : index
    %c0_85 = arith.constant 0 : index
    %287 = vector.load %arg9[%286, %c0_84, %c0_85] : memref<8x2x256xf32, #tpu.memory_space<vmem>>, vector<1x2x256xf32>
    %288 = vector.shape_cast %287 : vector<1x2x256xf32> to vector<2x256xf32>
    %289 = arith.truncf %281 : vector<2x64xf32> to vector<2x64xbf16>
    %cst_86 = arith.constant dense<0.000000e+00> : vector<2x256xf32>
    %290 = tpu.matmul %289, %38, %cst_86 {dimension_numbers = #tpu.dot_dimension_numbers<[1], [0], [0], [1], [0, 0, 1, 1], [], []>} : vector<2x64xbf16>, vector<64x256xbf16>, vector<2x256xf32> -> vector<2x256xf32>
    %291 = arith.addf %288, %290 : vector<2x256xf32>
    %292 = vector.extract_strided_slice %291 {offsets = [0, 0], sizes = [2, 64], strides = [1, 1]} : vector<2x256xf32> to vector<2x64xf32>
    %293 = arith.negf %292 : vector<2x64xf32>
    %294 = math.exp %293 : vector<2x64xf32>
    %cst_87 = arith.constant 1.000000e+00 : f32
    %295 = vector.broadcast %cst_87 : f32 to vector<2x64xf32>
    %296 = arith.addf %295, %294 : vector<2x64xf32>
    %297 = arith.divf %295, %296 : vector<2x64xf32>
    %298 = vector.extract_strided_slice %291 {offsets = [0, 64], sizes = [2, 64], strides = [1, 1]} : vector<2x256xf32> to vector<2x64xf32>
    %299 = arith.negf %298 : vector<2x64xf32>
    %300 = math.exp %299 : vector<2x64xf32>
    %cst_88 = arith.constant 1.000000e+00 : f32
    %301 = vector.broadcast %cst_88 : f32 to vector<2x64xf32>
    %302 = arith.addf %301, %300 : vector<2x64xf32>
    %303 = arith.divf %301, %302 : vector<2x64xf32>
    %304 = vector.extract_strided_slice %291 {offsets = [0, 128], sizes = [2, 64], strides = [1, 1]} : vector<2x256xf32> to vector<2x64xf32>
    %305 = math.tanh %304 : vector<2x64xf32>
    %306 = vector.extract_strided_slice %291 {offsets = [0, 192], sizes = [2, 64], strides = [1, 1]} : vector<2x256xf32> to vector<2x64xf32>
    %307 = arith.negf %306 : vector<2x64xf32>
    %308 = math.exp %307 : vector<2x64xf32>
    %cst_89 = arith.constant 1.000000e+00 : f32
    %309 = vector.broadcast %cst_89 : f32 to vector<2x64xf32>
    %310 = arith.addf %309, %308 : vector<2x64xf32>
    %311 = arith.divf %309, %310 : vector<2x64xf32>
    %312 = arith.mulf %303, %279 : vector<2x64xf32>
    %313 = arith.mulf %297, %305 : vector<2x64xf32>
    %314 = arith.addf %312, %313 : vector<2x64xf32>
    %315 = math.tanh %314 : vector<2x64xf32>
    %316 = arith.mulf %311, %315 : vector<2x64xf32>
    %317 = arith.index_cast %c7_i32 : i32 to index
    %c0_90 = arith.constant 0 : index
    %c0_91 = arith.constant 0 : index
    %318 = vector.load %arg10[%317, %c0_90, %c0_91] : memref<8x2x64xf32, #tpu.memory_space<vmem>>, vector<1x2x64xf32>
    %319 = vector.shape_cast %318 : vector<1x2x64xf32> to vector<2x64xf32>
    %320 = vector.shape_cast %316 : vector<2x64xf32> to vector<1x2x64xf32>
    tpu.vector_store %arg10[%317, %c0_90, %c0_91], %320 {strides = array<i32>} : memref<8x2x64xf32, #tpu.memory_space<vmem>>, vector<1x2x64xf32>,
    %c8_i32 = arith.constant 8 : i32
    %321 = vector.extract_strided_slice %316 {offsets = [0, 0], sizes = [2, 32], strides = [1, 1]} : vector<2x64xf32> to vector<2x32xf32>
    %c0_92 = arith.constant 0 : index
    %c0_93 = arith.constant 0 : index
    %c0_94 = arith.constant 0 : index
    %322 = vector.load %arg7[%c0_92, %c0_93, %c0_94] : memref<2x2x32xf32, #tpu.memory_space<vmem>>, vector<1x2x32xf32>
    %323 = vector.shape_cast %322 : vector<1x2x32xf32> to vector<2x32xf32>
    %324 = vector.shape_cast %321 : vector<2x32xf32> to vector<1x2x32xf32>
    tpu.vector_store %arg7[%c0_92, %c0_93, %c0_94], %324 {strides = array<i32>} : memref<2x2x32xf32, #tpu.memory_space<vmem>>, vector<1x2x32xf32>,
    %325 = vector.extract_strided_slice %316 {offsets = [0, 32], sizes = [2, 32], strides = [1, 1]} : vector<2x64xf32> to vector<2x32xf32>
    %c1_95 = arith.constant 1 : index
    %c0_96 = arith.constant 0 : index
    %c0_97 = arith.constant 0 : index
    %326 = vector.load %arg7[%c1_95, %c0_96, %c0_97] : memref<2x2x32xf32, #tpu.memory_space<vmem>>, vector<1x2x32xf32>
    %327 = vector.shape_cast %326 : vector<1x2x32xf32> to vector<2x32xf32>
    %328 = vector.shape_cast %325 : vector<2x32xf32> to vector<1x2x32xf32>
    tpu.vector_store %arg7[%c1_95, %c0_96, %c0_97], %328 {strides = array<i32>} : memref<2x2x32xf32, #tpu.memory_space<vmem>>, vector<1x2x32xf32>,
    %329 = vector.extract_strided_slice %314 {offsets = [0, 0], sizes = [2, 32], strides = [1, 1]} : vector<2x64xf32> to vector<2x32xf32>
    %c0_98 = arith.constant 0 : index
    %c0_99 = arith.constant 0 : index
    %c0_100 = arith.constant 0 : index
    %330 = vector.load %arg8[%c0_98, %c0_99, %c0_100] : memref<2x2x32xf32, #tpu.memory_space<vmem>>, vector<1x2x32xf32>
    %331 = vector.shape_cast %330 : vector<1x2x32xf32> to vector<2x32xf32>
    %332 = vector.shape_cast %329 : vector<2x32xf32> to vector<1x2x32xf32>
    tpu.vector_store %arg8[%c0_98, %c0_99, %c0_100], %332 {strides = array<i32>} : memref<2x2x32xf32, #tpu.memory_space<vmem>>, vector<1x2x32xf32>,
    %333 = vector.extract_strided_slice %314 {offsets = [0, 32], sizes = [2, 32], strides = [1, 1]} : vector<2x64xf32> to vector<2x32xf32>
    %c1_101 = arith.constant 1 : index
    %c0_102 = arith.constant 0 : index
    %c0_103 = arith.constant 0 : index
    %334 = vector.load %arg8[%c1_101, %c0_102, %c0_103] : memref<2x2x32xf32, #tpu.memory_space<vmem>>, vector<1x2x32xf32>
    %335 = vector.shape_cast %334 : vector<1x2x32xf32> to vector<2x32xf32>
    %336 = vector.shape_cast %333 : vector<2x32xf32> to vector<1x2x32xf32>
    tpu.vector_store %arg8[%c1_101, %c0_102, %c0_103], %336 {strides = array<i32>} : memref<2x2x32xf32, #tpu.memory_space<vmem>>, vector<1x2x32xf32>,
    %c0_104 = arith.constant 0 : index
    %c0_105 = arith.constant 0 : index
    %c0_106 = arith.constant 0 : index
    %337 = vector.load %arg10[%c0_104, %c0_105, %c0_106] : memref<8x2x64xf32, #tpu.memory_space<vmem>>, vector<1x2x64xf32>
    %338 = vector.shape_cast %337 : vector<1x2x64xf32> to vector<2x64xf32>
    %c7_107 = arith.constant 7 : index
    %c0_108 = arith.constant 0 : index
    %c0_109 = arith.constant 0 : index
    %339 = vector.load %arg10[%c7_107, %c0_108, %c0_109] : memref<8x2x64xf32, #tpu.memory_space<vmem>>, vector<1x2x64xf32>
    %340 = vector.shape_cast %339 : vector<1x2x64xf32> to vector<2x64xf32>
    %341 = vector.extract_strided_slice %338 {offsets = [0, 0], sizes = [2, 32], strides = [1, 1]} : vector<2x64xf32> to vector<2x32xf32>
    %342 = vector.extract_strided_slice %340 {offsets = [0, 32], sizes = [2, 32], strides = [1, 1]} : vector<2x64xf32> to vector<2x32xf32>
    %343 = tpu.concatenate %341, %342 in 1 : vector<2x32xf32>, vector<2x32xf32> -> vector<2x64xf32>
    %344 = arith.truncf %343 : vector<2x64xf32> to vector<2x64xbf16>
    %345 = vector.extract_strided_slice %344 {offsets = [0, 0], sizes = [1, 64], strides = [1, 1]} : vector<2x64xbf16> to vector<1x64xbf16>
    %c0_110 = arith.constant 0 : index
    %c0_111 = arith.constant 0 : index
    %c0_112 = arith.constant 0 : index
    %346 = vector.load %arg6[%c0_110, %c0_111, %c0_112] : memref<2x8x64xbf16, #tpu.memory_space<vmem>>, vector<1x1x64xbf16>
    %347 = vector.shape_cast %346 : vector<1x1x64xbf16> to vector<1x64xbf16>
    %348 = vector.shape_cast %345 : vector<1x64xbf16> to vector<1x1x64xbf16>
    tpu.vector_store %arg6[%c0_110, %c0_111, %c0_112], %348 {strides = array<i32>} : memref<2x8x64xbf16, #tpu.memory_space<vmem>>, vector<1x1x64xbf16>,
    %349 = vector.extract_strided_slice %344 {offsets = [1, 0], sizes = [1, 64], strides = [1, 1]} : vector<2x64xbf16> to vector<1x64xbf16>
    %c1_113 = arith.constant 1 : index
    %c0_114 = arith.constant 0 : index
    %c0_115 = arith.constant 0 : index
    %350 = vector.load %arg6[%c1_113, %c0_114, %c0_115] : memref<2x8x64xbf16, #tpu.memory_space<vmem>>, vector<1x1x64xbf16>
    %351 = vector.shape_cast %350 : vector<1x1x64xbf16> to vector<1x64xbf16>
    %352 = vector.shape_cast %349 : vector<1x64xbf16> to vector<1x1x64xbf16>
    tpu.vector_store %arg6[%c1_113, %c0_114, %c0_115], %352 {strides = array<i32>} : memref<2x8x64xbf16, #tpu.memory_space<vmem>>, vector<1x1x64xbf16>,
    %c1_116 = arith.constant 1 : index
    %c0_117 = arith.constant 0 : index
    %c0_118 = arith.constant 0 : index
    %353 = vector.load %arg10[%c1_116, %c0_117, %c0_118] : memref<8x2x64xf32, #tpu.memory_space<vmem>>, vector<1x2x64xf32>
    %354 = vector.shape_cast %353 : vector<1x2x64xf32> to vector<2x64xf32>
    %c6_119 = arith.constant 6 : index
    %c0_120 = arith.constant 0 : index
    %c0_121 = arith.constant 0 : index
    %355 = vector.load %arg10[%c6_119, %c0_120, %c0_121] : memref<8x2x64xf32, #tpu.memory_space<vmem>>, vector<1x2x64xf32>
    %356 = vector.shape_cast %355 : vector<1x2x64xf32> to vector<2x64xf32>
    %357 = vector.extract_strided_slice %354 {offsets = [0, 0], sizes = [2, 32], strides = [1, 1]} : vector<2x64xf32> to vector<2x32xf32>
    %358 = vector.extract_strided_slice %356 {offsets = [0, 32], sizes = [2, 32], strides = [1, 1]} : vector<2x64xf32> to vector<2x32xf32>
    %359 = tpu.concatenate %357, %358 in 1 : vector<2x32xf32>, vector<2x32xf32> -> vector<2x64xf32>
    %360 = arith.truncf %359 : vector<2x64xf32> to vector<2x64xbf16>
    %361 = vector.extract_strided_slice %360 {offsets = [0, 0], sizes = [1, 64], strides = [1, 1]} : vector<2x64xbf16> to vector<1x64xbf16>
    %c0_122 = arith.constant 0 : index
    %c1_123 = arith.constant 1 : index
    %c0_124 = arith.constant 0 : index
    %362 = vector.load %arg6[%c0_122, %c1_123, %c0_124] : memref<2x8x64xbf16, #tpu.memory_space<vmem>>, vector<1x1x64xbf16>
    %363 = vector.shape_cast %362 : vector<1x1x64xbf16> to vector<1x64xbf16>
    %364 = vector.shape_cast %361 : vector<1x64xbf16> to vector<1x1x64xbf16>
    tpu.vector_store %arg6[%c0_122, %c1_123, %c0_124], %364 {strides = array<i32>} : memref<2x8x64xbf16, #tpu.memory_space<vmem>>, vector<1x1x64xbf16>,
    %365 = vector.extract_strided_slice %360 {offsets = [1, 0], sizes = [1, 64], strides = [1, 1]} : vector<2x64xbf16> to vector<1x64xbf16>
    %c1_125 = arith.constant 1 : index
    %c1_126 = arith.constant 1 : index
    %c0_127 = arith.constant 0 : index
    %366 = vector.load %arg6[%c1_125, %c1_126, %c0_127] : memref<2x8x64xbf16, #tpu.memory_space<vmem>>, vector<1x1x64xbf16>
    %367 = vector.shape_cast %366 : vector<1x1x64xbf16> to vector<1x64xbf16>
    %368 = vector.shape_cast %365 : vector<1x64xbf16> to vector<1x1x64xbf16>
    tpu.vector_store %arg6[%c1_125, %c1_126, %c0_127], %368 {strides = array<i32>} : memref<2x8x64xbf16, #tpu.memory_space<vmem>>, vector<1x1x64xbf16>,
    %c2_128 = arith.constant 2 : index
    %c0_129 = arith.constant 0 : index
    %c0_130 = arith.constant 0 : index
    %369 = vector.load %arg10[%c2_128, %c0_129, %c0_130] : memref<8x2x64xf32, #tpu.memory_space<vmem>>, vector<1x2x64xf32>
    %370 = vector.shape_cast %369 : vector<1x2x64xf32> to vector<2x64xf32>
    %c5_131 = arith.constant 5 : index
    %c0_132 = arith.constant 0 : index
    %c0_133 = arith.constant 0 : index
    %371 = vector.load %arg10[%c5_131, %c0_132, %c0_133] : memref<8x2x64xf32, #tpu.memory_space<vmem>>, vector<1x2x64xf32>
    %372 = vector.shape_cast %371 : vector<1x2x64xf32> to vector<2x64xf32>
    %373 = vector.extract_strided_slice %370 {offsets = [0, 0], sizes = [2, 32], strides = [1, 1]} : vector<2x64xf32> to vector<2x32xf32>
    %374 = vector.extract_strided_slice %372 {offsets = [0, 32], sizes = [2, 32], strides = [1, 1]} : vector<2x64xf32> to vector<2x32xf32>
    %375 = tpu.concatenate %373, %374 in 1 : vector<2x32xf32>, vector<2x32xf32> -> vector<2x64xf32>
    %376 = arith.truncf %375 : vector<2x64xf32> to vector<2x64xbf16>
    %377 = vector.extract_strided_slice %376 {offsets = [0, 0], sizes = [1, 64], strides = [1, 1]} : vector<2x64xbf16> to vector<1x64xbf16>
    %c0_134 = arith.constant 0 : index
    %c2_135 = arith.constant 2 : index
    %c0_136 = arith.constant 0 : index
    %378 = vector.load %arg6[%c0_134, %c2_135, %c0_136] : memref<2x8x64xbf16, #tpu.memory_space<vmem>>, vector<1x1x64xbf16>
    %379 = vector.shape_cast %378 : vector<1x1x64xbf16> to vector<1x64xbf16>
    %380 = vector.shape_cast %377 : vector<1x64xbf16> to vector<1x1x64xbf16>
    tpu.vector_store %arg6[%c0_134, %c2_135, %c0_136], %380 {strides = array<i32>} : memref<2x8x64xbf16, #tpu.memory_space<vmem>>, vector<1x1x64xbf16>,
    %381 = vector.extract_strided_slice %376 {offsets = [1, 0], sizes = [1, 64], strides = [1, 1]} : vector<2x64xbf16> to vector<1x64xbf16>
    %c1_137 = arith.constant 1 : index
    %c2_138 = arith.constant 2 : index
    %c0_139 = arith.constant 0 : index
    %382 = vector.load %arg6[%c1_137, %c2_138, %c0_139] : memref<2x8x64xbf16, #tpu.memory_space<vmem>>, vector<1x1x64xbf16>
    %383 = vector.shape_cast %382 : vector<1x1x64xbf16> to vector<1x64xbf16>
    %384 = vector.shape_cast %381 : vector<1x64xbf16> to vector<1x1x64xbf16>
    tpu.vector_store %arg6[%c1_137, %c2_138, %c0_139], %384 {strides = array<i32>} : memref<2x8x64xbf16, #tpu.memory_space<vmem>>, vector<1x1x64xbf16>,
    %c3_140 = arith.constant 3 : index
    %c0_141 = arith.constant 0 : index
    %c0_142 = arith.constant 0 : index
    %385 = vector.load %arg10[%c3_140, %c0_141, %c0_142] : memref<8x2x64xf32, #tpu.memory_space<vmem>>, vector<1x2x64xf32>
    %386 = vector.shape_cast %385 : vector<1x2x64xf32> to vector<2x64xf32>
    %c4_143 = arith.constant 4 : index
    %c0_144 = arith.constant 0 : index
    %c0_145 = arith.constant 0 : index
    %387 = vector.load %arg10[%c4_143, %c0_144, %c0_145] : memref<8x2x64xf32, #tpu.memory_space<vmem>>, vector<1x2x64xf32>
    %388 = vector.shape_cast %387 : vector<1x2x64xf32> to vector<2x64xf32>
    %389 = vector.extract_strided_slice %386 {offsets = [0, 0], sizes = [2, 32], strides = [1, 1]} : vector<2x64xf32> to vector<2x32xf32>
    %390 = vector.extract_strided_slice %388 {offsets = [0, 32], sizes = [2, 32], strides = [1, 1]} : vector<2x64xf32> to vector<2x32xf32>
    %391 = tpu.concatenate %389, %390 in 1 : vector<2x32xf32>, vector<2x32xf32> -> vector<2x64xf32>
    %392 = arith.truncf %391 : vector<2x64xf32> to vector<2x64xbf16>
    %393 = vector.extract_strided_slice %392 {offsets = [0, 0], sizes = [1, 64], strides = [1, 1]} : vector<2x64xbf16> to vector<1x64xbf16>
    %c0_146 = arith.constant 0 : index
    %c3_147 = arith.constant 3 : index
    %c0_148 = arith.constant 0 : index
    %394 = vector.load %arg6[%c0_146, %c3_147, %c0_148] : memref<2x8x64xbf16, #tpu.memory_space<vmem>>, vector<1x1x64xbf16>
    %395 = vector.shape_cast %394 : vector<1x1x64xbf16> to vector<1x64xbf16>
    %396 = vector.shape_cast %393 : vector<1x64xbf16> to vector<1x1x64xbf16>
    tpu.vector_store %arg6[%c0_146, %c3_147, %c0_148], %396 {strides = array<i32>} : memref<2x8x64xbf16, #tpu.memory_space<vmem>>, vector<1x1x64xbf16>,
    %397 = vector.extract_strided_slice %392 {offsets = [1, 0], sizes = [1, 64], strides = [1, 1]} : vector<2x64xbf16> to vector<1x64xbf16>
    %c1_149 = arith.constant 1 : index
    %c3_150 = arith.constant 3 : index
    %c0_151 = arith.constant 0 : index
    %398 = vector.load %arg6[%c1_149, %c3_150, %c0_151] : memref<2x8x64xbf16, #tpu.memory_space<vmem>>, vector<1x1x64xbf16>
    %399 = vector.shape_cast %398 : vector<1x1x64xbf16> to vector<1x64xbf16>
    %400 = vector.shape_cast %397 : vector<1x64xbf16> to vector<1x1x64xbf16>
    tpu.vector_store %arg6[%c1_149, %c3_150, %c0_151], %400 {strides = array<i32>} : memref<2x8x64xbf16, #tpu.memory_space<vmem>>, vector<1x1x64xbf16>,
    %c4_152 = arith.constant 4 : index
    %c0_153 = arith.constant 0 : index
    %c0_154 = arith.constant 0 : index
    %401 = vector.load %arg10[%c4_152, %c0_153, %c0_154] : memref<8x2x64xf32, #tpu.memory_space<vmem>>, vector<1x2x64xf32>
    %402 = vector.shape_cast %401 : vector<1x2x64xf32> to vector<2x64xf32>
    %c3_155 = arith.constant 3 : index
    %c0_156 = arith.constant 0 : index
    %c0_157 = arith.constant 0 : index
    %403 = vector.load %arg10[%c3_155, %c0_156, %c0_157] : memref<8x2x64xf32, #tpu.memory_space<vmem>>, vector<1x2x64xf32>
    %404 = vector.shape_cast %403 : vector<1x2x64xf32> to vector<2x64xf32>
    %405 = vector.extract_strided_slice %402 {offsets = [0, 0], sizes = [2, 32], strides = [1, 1]} : vector<2x64xf32> to vector<2x32xf32>
    %406 = vector.extract_strided_slice %404 {offsets = [0, 32], sizes = [2, 32], strides = [1, 1]} : vector<2x64xf32> to vector<2x32xf32>
    %407 = tpu.concatenate %405, %406 in 1 : vector<2x32xf32>, vector<2x32xf32> -> vector<2x64xf32>
    %408 = arith.truncf %407 : vector<2x64xf32> to vector<2x64xbf16>
    %409 = vector.extract_strided_slice %408 {offsets = [0, 0], sizes = [1, 64], strides = [1, 1]} : vector<2x64xbf16> to vector<1x64xbf16>
    %c0_158 = arith.constant 0 : index
    %c4_159 = arith.constant 4 : index
    %c0_160 = arith.constant 0 : index
    %410 = vector.load %arg6[%c0_158, %c4_159, %c0_160] : memref<2x8x64xbf16, #tpu.memory_space<vmem>>, vector<1x1x64xbf16>
    %411 = vector.shape_cast %410 : vector<1x1x64xbf16> to vector<1x64xbf16>
    %412 = vector.shape_cast %409 : vector<1x64xbf16> to vector<1x1x64xbf16>
    tpu.vector_store %arg6[%c0_158, %c4_159, %c0_160], %412 {strides = array<i32>} : memref<2x8x64xbf16, #tpu.memory_space<vmem>>, vector<1x1x64xbf16>,
    %413 = vector.extract_strided_slice %408 {offsets = [1, 0], sizes = [1, 64], strides = [1, 1]} : vector<2x64xbf16> to vector<1x64xbf16>
    %c1_161 = arith.constant 1 : index
    %c4_162 = arith.constant 4 : index
    %c0_163 = arith.constant 0 : index
    %414 = vector.load %arg6[%c1_161, %c4_162, %c0_163] : memref<2x8x64xbf16, #tpu.memory_space<vmem>>, vector<1x1x64xbf16>
    %415 = vector.shape_cast %414 : vector<1x1x64xbf16> to vector<1x64xbf16>
    %416 = vector.shape_cast %413 : vector<1x64xbf16> to vector<1x1x64xbf16>
    tpu.vector_store %arg6[%c1_161, %c4_162, %c0_163], %416 {strides = array<i32>} : memref<2x8x64xbf16, #tpu.memory_space<vmem>>, vector<1x1x64xbf16>,
    %c5_164 = arith.constant 5 : index
    %c0_165 = arith.constant 0 : index
    %c0_166 = arith.constant 0 : index
    %417 = vector.load %arg10[%c5_164, %c0_165, %c0_166] : memref<8x2x64xf32, #tpu.memory_space<vmem>>, vector<1x2x64xf32>
    %418 = vector.shape_cast %417 : vector<1x2x64xf32> to vector<2x64xf32>
    %c2_167 = arith.constant 2 : index
    %c0_168 = arith.constant 0 : index
    %c0_169 = arith.constant 0 : index
    %419 = vector.load %arg10[%c2_167, %c0_168, %c0_169] : memref<8x2x64xf32, #tpu.memory_space<vmem>>, vector<1x2x64xf32>
    %420 = vector.shape_cast %419 : vector<1x2x64xf32> to vector<2x64xf32>
    %421 = vector.extract_strided_slice %418 {offsets = [0, 0], sizes = [2, 32], strides = [1, 1]} : vector<2x64xf32> to vector<2x32xf32>
    %422 = vector.extract_strided_slice %420 {offsets = [0, 32], sizes = [2, 32], strides = [1, 1]} : vector<2x64xf32> to vector<2x32xf32>
    %423 = tpu.concatenate %421, %422 in 1 : vector<2x32xf32>, vector<2x32xf32> -> vector<2x64xf32>
    %424 = arith.truncf %423 : vector<2x64xf32> to vector<2x64xbf16>
    %425 = vector.extract_strided_slice %424 {offsets = [0, 0], sizes = [1, 64], strides = [1, 1]} : vector<2x64xbf16> to vector<1x64xbf16>
    %c0_170 = arith.constant 0 : index
    %c5_171 = arith.constant 5 : index
    %c0_172 = arith.constant 0 : index
    %426 = vector.load %arg6[%c0_170, %c5_171, %c0_172] : memref<2x8x64xbf16, #tpu.memory_space<vmem>>, vector<1x1x64xbf16>
    %427 = vector.shape_cast %426 : vector<1x1x64xbf16> to vector<1x64xbf16>
    %428 = vector.shape_cast %425 : vector<1x64xbf16> to vector<1x1x64xbf16>
    tpu.vector_store %arg6[%c0_170, %c5_171, %c0_172], %428 {strides = array<i32>} : memref<2x8x64xbf16, #tpu.memory_space<vmem>>, vector<1x1x64xbf16>,
    %429 = vector.extract_strided_slice %424 {offsets = [1, 0], sizes = [1, 64], strides = [1, 1]} : vector<2x64xbf16> to vector<1x64xbf16>
    %c1_173 = arith.constant 1 : index
    %c5_174 = arith.constant 5 : index
    %c0_175 = arith.constant 0 : index
    %430 = vector.load %arg6[%c1_173, %c5_174, %c0_175] : memref<2x8x64xbf16, #tpu.memory_space<vmem>>, vector<1x1x64xbf16>
    %431 = vector.shape_cast %430 : vector<1x1x64xbf16> to vector<1x64xbf16>
    %432 = vector.shape_cast %429 : vector<1x64xbf16> to vector<1x1x64xbf16>
    tpu.vector_store %arg6[%c1_173, %c5_174, %c0_175], %432 {strides = array<i32>} : memref<2x8x64xbf16, #tpu.memory_space<vmem>>, vector<1x1x64xbf16>,
    %c6_176 = arith.constant 6 : index
    %c0_177 = arith.constant 0 : index
    %c0_178 = arith.constant 0 : index
    %433 = vector.load %arg10[%c6_176, %c0_177, %c0_178] : memref<8x2x64xf32, #tpu.memory_space<vmem>>, vector<1x2x64xf32>
    %434 = vector.shape_cast %433 : vector<1x2x64xf32> to vector<2x64xf32>
    %c1_179 = arith.constant 1 : index
    %c0_180 = arith.constant 0 : index
    %c0_181 = arith.constant 0 : index
    %435 = vector.load %arg10[%c1_179, %c0_180, %c0_181] : memref<8x2x64xf32, #tpu.memory_space<vmem>>, vector<1x2x64xf32>
    %436 = vector.shape_cast %435 : vector<1x2x64xf32> to vector<2x64xf32>
    %437 = vector.extract_strided_slice %434 {offsets = [0, 0], sizes = [2, 32], strides = [1, 1]} : vector<2x64xf32> to vector<2x32xf32>
    %438 = vector.extract_strided_slice %436 {offsets = [0, 32], sizes = [2, 32], strides = [1, 1]} : vector<2x64xf32> to vector<2x32xf32>
    %439 = tpu.concatenate %437, %438 in 1 : vector<2x32xf32>, vector<2x32xf32> -> vector<2x64xf32>
    %440 = arith.truncf %439 : vector<2x64xf32> to vector<2x64xbf16>
    %441 = vector.extract_strided_slice %440 {offsets = [0, 0], sizes = [1, 64], strides = [1, 1]} : vector<2x64xbf16> to vector<1x64xbf16>
    %c0_182 = arith.constant 0 : index
    %c6_183 = arith.constant 6 : index
    %c0_184 = arith.constant 0 : index
    %442 = vector.load %arg6[%c0_182, %c6_183, %c0_184] : memref<2x8x64xbf16, #tpu.memory_space<vmem>>, vector<1x1x64xbf16>
    %443 = vector.shape_cast %442 : vector<1x1x64xbf16> to vector<1x64xbf16>
    %444 = vector.shape_cast %441 : vector<1x64xbf16> to vector<1x1x64xbf16>
    tpu.vector_store %arg6[%c0_182, %c6_183, %c0_184], %444 {strides = array<i32>} : memref<2x8x64xbf16, #tpu.memory_space<vmem>>, vector<1x1x64xbf16>,
    %445 = vector.extract_strided_slice %440 {offsets = [1, 0], sizes = [1, 64], strides = [1, 1]} : vector<2x64xbf16> to vector<1x64xbf16>
    %c1_185 = arith.constant 1 : index
    %c6_186 = arith.constant 6 : index
    %c0_187 = arith.constant 0 : index
    %446 = vector.load %arg6[%c1_185, %c6_186, %c0_187] : memref<2x8x64xbf16, #tpu.memory_space<vmem>>, vector<1x1x64xbf16>
    %447 = vector.shape_cast %446 : vector<1x1x64xbf16> to vector<1x64xbf16>
    %448 = vector.shape_cast %445 : vector<1x64xbf16> to vector<1x1x64xbf16>
    tpu.vector_store %arg6[%c1_185, %c6_186, %c0_187], %448 {strides = array<i32>} : memref<2x8x64xbf16, #tpu.memory_space<vmem>>, vector<1x1x64xbf16>,
    %c7_188 = arith.constant 7 : index
    %c0_189 = arith.constant 0 : index
    %c0_190 = arith.constant 0 : index
    %449 = vector.load %arg10[%c7_188, %c0_189, %c0_190] : memref<8x2x64xf32, #tpu.memory_space<vmem>>, vector<1x2x64xf32>
    %450 = vector.shape_cast %449 : vector<1x2x64xf32> to vector<2x64xf32>
    %c0_191 = arith.constant 0 : index
    %c0_192 = arith.constant 0 : index
    %c0_193 = arith.constant 0 : index
    %451 = vector.load %arg10[%c0_191, %c0_192, %c0_193] : memref<8x2x64xf32, #tpu.memory_space<vmem>>, vector<1x2x64xf32>
    %452 = vector.shape_cast %451 : vector<1x2x64xf32> to vector<2x64xf32>
    %453 = vector.extract_strided_slice %450 {offsets = [0, 0], sizes = [2, 32], strides = [1, 1]} : vector<2x64xf32> to vector<2x32xf32>
    %454 = vector.extract_strided_slice %452 {offsets = [0, 32], sizes = [2, 32], strides = [1, 1]} : vector<2x64xf32> to vector<2x32xf32>
    %455 = tpu.concatenate %453, %454 in 1 : vector<2x32xf32>, vector<2x32xf32> -> vector<2x64xf32>
    %456 = arith.truncf %455 : vector<2x64xf32> to vector<2x64xbf16>
    %457 = vector.extract_strided_slice %456 {offsets = [0, 0], sizes = [1, 64], strides = [1, 1]} : vector<2x64xbf16> to vector<1x64xbf16>
    %c0_194 = arith.constant 0 : index
    %c7_195 = arith.constant 7 : index
    %c0_196 = arith.constant 0 : index
    %458 = vector.load %arg6[%c0_194, %c7_195, %c0_196] : memref<2x8x64xbf16, #tpu.memory_space<vmem>>, vector<1x1x64xbf16>
    %459 = vector.shape_cast %458 : vector<1x1x64xbf16> to vector<1x64xbf16>
    %460 = vector.shape_cast %457 : vector<1x64xbf16> to vector<1x1x64xbf16>
    tpu.vector_store %arg6[%c0_194, %c7_195, %c0_196], %460 {strides = array<i32>} : memref<2x8x64xbf16, #tpu.memory_space<vmem>>, vector<1x1x64xbf16>,
    %461 = vector.extract_strided_slice %456 {offsets = [1, 0], sizes = [1, 64], strides = [1, 1]} : vector<2x64xbf16> to vector<1x64xbf16>
    %c1_197 = arith.constant 1 : index
    %c7_198 = arith.constant 7 : index
    %c0_199 = arith.constant 0 : index
    %462 = vector.load %arg6[%c1_197, %c7_198, %c0_199] : memref<2x8x64xbf16, #tpu.memory_space<vmem>>, vector<1x1x64xbf16>
    %463 = vector.shape_cast %462 : vector<1x1x64xbf16> to vector<1x64xbf16>
    %464 = vector.shape_cast %461 : vector<1x64xbf16> to vector<1x1x64xbf16>
    tpu.vector_store %arg6[%c1_197, %c7_198, %c0_199], %464 {strides = array<i32>} : memref<2x8x64xbf16, #tpu.memory_space<vmem>>, vector<1x1x64xbf16>,
    return
  }
}

</mosaic_0001>

<bundles_post_ra>
// kernel: att_bilstm_forward.5
= control target key start
LH: loop header
LB: loop body
LE: loop exit
PB: predicated region body
PF: predicated region fallthrough
CT: control target
= control target key end

     0   :  { %v733_v2 = vmov 0   ;;  %s962_s0 = inlined_call_operand.vmem [shape: bf16[2,8,64], index: 0, kind: input, shape index: {}]   ;;  %s963_s1 = inlined_call_operand.vmem [shape: f32[2,1,8], index: 1, kind: input, shape index: {}]   ;;  %s964_s2 = inlined_call_operand.vmem [shape: f32[2,8,1], index: 2, kind: input, shape index: {}]   ;;  %s965_s3 = inlined_call_operand.vmem [shape: bf16[64,192], index: 3, kind: input, shape index: {}]   ;;  %s966_s4 = inlined_call_operand.vmem [shape: f32[1,192], index: 4, kind: input, shape index: {}]   ;;  %s967_s5 = inlined_call_operand.vmem [shape: bf16[64,64], index: 5, kind: input, shape index: {}]   ;;  %s968_s6 = inlined_call_operand.vmem [shape: f32[1,64], index: 6, kind: input, shape index: {}]   ;;  %s969_s7 = inlined_call_operand.hbm [shape: f32[2,8,64], index: 7, kind: output, shape index: {}]  }
   0x1   :  { %v783_v0 = vld [vmem:[%s965_s3 + $0x4] ss:$8 sps:$4 sm:$0xff]   ;;  %v788_v1 = vld [vmem:[%s965_s3] ss:$8 sps:$4 sm:$0xff]   ;;  %144 = vmatprep.mubr.bf16.mxu0 %v733_v2  ;;  %684 = vset.pattern.permute.xlu0 %v733_v2  ;;  %v796_v3 = vld [vmem:[%s965_s3 + $0x14] ss:$8 sps:$4 sm:$0xff]  }
   0x2   :  { %112 = vmatprep.subr.bf16.mxu0 %v783_v0  ;;  %v802_v4 = vld [vmem:[%s965_s3 + $0x10] ss:$8 sps:$4 sm:$0xff]   ;;  %v808_v5 = vld [vmem:[%s965_s3 + $0x24] ss:$8 sps:$4 sm:$0xff]   ;;  %v813_v6 = vld [vmem:[%s965_s3 + $0x20] ss:$8 sps:$4 sm:$0xff]  }
   0x3   :  { %113 = vmatpush1.bf16.msra.mxu0 %v788_v1  ;;  %v818_v7 = vld [vmem:[%s965_s3 + $0x34] ss:$8 sps:$4 sm:$0xff]  }
   0x4   :  { %114 = vmatprep.subr.bf16.mxu0 %v796_v3 }
   0x7   :  { %115 = vmatpush1.bf16.msra.mxu0 %v802_v4 }
   0x8   :  { %116 = vmatprep.subr.bf16.mxu0 %v808_v5 }
   0x9   :  { %12 = vsyncpa [#allocation3], 0  ;;  %v826_v8 = vld [vmem:[%s965_s3 + $0x30] ss:$8 sps:$4 sm:$0xff]   ;;  %v28_v9 = vld [vmem:[%s962_s0] sm:$0xf]  ;;  %v52_v10 = vlaneseq }
   0xa   :  { %vm108_vm0 = vcmask 523264   ;;  %v734_v12 = vmov 0.0   ;;  %v42_v14 = vld [vmem:[%s966_s4] sm:$0x3]  ;;  %vm735_vm1 = vmmov 0   ;;  %v33_v23 = vld [vmem:[%s964_s2 + $0x8] sm:$0xff] }
   0xb   :  { %117 = vmatpush1.bf16.msra.mxu0 %v813_v6  ;;  %v834_v11 = vshrl.u32 %v52_v10, 7  ;;  %629 = vmatprep.subr.bf16.mxu1 %v734_v12  ;;  %v32_v19 = vld [vmem:[%s964_s2] sm:$0xff]  ;;  %s736_s23 = smov 64   ;;  %vm453_vm3 = vcmp.gt.f32.partialorder %v33_v23, 0.0  ;;  %vm238_vm4 = vcmask 1043456   ;;  %v877_v39 = vand.u32 127, %v52_v10 }
   0xc   :  { %118 = vmatprep.subr.bf16.mxu0 %v818_v7  ;;  %631 = vmatprep.mubr.msk.bf16.mxu1 %vm735_vm1, %v734_v12  ;;  %vm205_vm2 = vcmp.gt.f32.partialorder %v32_v19, 0.0  ;;  %v455_v25 = vsel %vm453_vm3, 1, %v733_v2  ;;  %v30_v35 = vld [vmem:[%s963_s1] sm:$0x1]  ;;  %vm221_vm11 = vcmask 64512   ;;  %v698_v52 = vld [vmem:[%s967_s5 + $0x8] sm:$0xff]  }
   0xd   :  { %v839_v13 = vsub.s32 0, %v834_v11  ;;  %v207_v24 = vsel %vm205_vm2, 1, %v733_v2  ;;  %v64_v26 = vsub.s32 1, %v834_v11  ;;  %vm206_vm5 = vcmp.gt.f32.partialorder %v30_v35, 0.0  ;;  %v697_v51 = vld [vmem:[%s967_s5] sm:$0xff]   ;;  %v699_v53 = vld [vmem:[%s967_s5 + $0x10] sm:$0xff]  }
   0xe   :  { %v212_v36 = vsel %vm206_vm5, 1, %v733_v2  ;;  %vm56_vm9 = vcmp.eq.s32.totalorder %v834_v11, %v877_v39  ;;  %v29_v58 = vld [vmem:[%s962_s0 + $0x4] sm:$0xf]  ;;  %v700_v59 = vld [vmem:[%s967_s5 + $0x18] sm:$0xff]  }
   0xf   :  { %119 = vmatpush1.bf16.msra.mxu0 %v826_v8  ;;  %v849_v15 = vrot.slane %v42_v14, %v839_v13  ;;  %v862_v27 = vrot.slane %v42_v14, %v64_v26  ;;  %v216_v37 = vrot.slane %v212_v36, %v839_v13 }
  0x10   :  { %641 = vmatprep.subr.bf16.mxu0 %v734_v12 }
  0x11   :  { %vm217_vm6 = vcmp.eq.s32.totalorder %v216_v37, 1 }
  0x12   :  { %598 = vmatmul.mubr.msk.bf16.vlgmr.msra.gmra.mrb[0].mxu0 %vm108_vm0, %v28_v9 }
  0x13   :  { %649 = vmatprep.mubr.msk.bf16.mxu0 %vm735_vm1, %v734_v12  ;;  %642 = vmatpush3.bf16.msra.mxu0 %v697_v51 }
  0x14   :  { %643 = vmatprep.subr.bf16.mxu0 %v734_v12 }
  0x17   :  { %644 = vmatpush3.bf16.msra.mxu0 %v698_v52 }
  0x18   :  { %645 = vmatprep.subr.bf16.mxu0 %v734_v12 }
  0x1b   :  { %646 = vmatpush3.bf16.msra.mxu0 %v699_v53 }
  0x1c   :  { %647 = vmatprep.subr.bf16.mxu0 %v734_v12 }
  0x1f   :  { %648 = vmatpush3.bf16.msra.mxu0 %v700_v59 }
  0x20   :  { %665 = vmatprep.subr.bf16.mxu0 %v734_v12 }
  0xe5   :  { %v146_v16 = vpop.f32.mrb[0].mxu0 }
  0xe6   :  { %v147_v17 = vadd.f32 %v146_v16, %v849_v15  ;;  %v148_v18 = vpop.f32.mrb[1].mxu0 }
  0xe7   :  { %v150_v20 = vpop.f32.mrb[2].mxu0  ;;  %v149_v29 = vadd.f32 %v148_v18, %v862_v27 }
  0xe8   :  { %v151_v21 = vpop.f32.mrb[3].mxu0  ;;  %v155_v22 = vpack.c.bf16 %v147_v17, %v147_v17  ;;  %v153_v31 = vmul.f32 0.125, %v147_v17 }
  0xe9   :  { %v234_v32 = vpack.c.bf16 %v149_v29, %v149_v29 }
  0xea   :  { %157 = vrot.lane.b32.xlu0 %v155_v22, %s736_s23  ;;  %v154_v33 = vpack.c.bf16 %v153_v31, %v153_v31 }
  0xeb   :  { %v240_v34 = vsel %vm238_vm4, %v234_v32, 0 }
  0xee   :  { %209 = vperm.xlu0 %684, %v207_v24   ;;  %v31_v24 = vld [vmem:[%s963_s1 + $0x1] sm:$0x1]  ;;  %s737_s1 = smov [#allocation2]  }
  0xef   :  { %vm454_vm12 = vcmp.gt.f32.partialorder %v31_v24, 0.0 }
  0xf2   :  { %457 = vperm.xlu0 %684, %v455_v25   ;;  %v460_v25 = vsel %vm454_vm12, 1, %v733_v2 }
 0x15c   :  { %v158_v28 = vpop.permute.xlu0 %157 }
 0x15d   :  { %v163_v30 = vsel %vm108_vm0, %v158_v28, 0 }
 0x15e   :  { %630 = vmatpush3.bf16.xpose.msra.mxu1 %v163_v30 }
 0x15f   :  { %635 = vmatprep.subr.bf16.mxu1 %v734_v12 }
 0x165   :  { %632 = vmatmul.mubr.msk.bf16.vlgmr.msra.gmra.mrb[0].mxu1 %vm108_vm0, %v154_v33 }
 0x166   :  { %636 = vmatpush3.bf16.msra.mxu1 %v240_v34  ;;  %637 = vmatprep.mubr.msk.bf16.mxu1 %vm735_vm1, %v734_v12 }
 0x167   :  { %360 = vmatprep.subr.bf16.mxu1 %v783_v0 }
 0x16d   :  { %v210_v38 = vpop.permute.xlu0 %209 }
 0x16e   :  { %vm211_vm7 = vcmp.eq.s32.totalorder %v210_v38, 1 }
 0x16f   :  { %vm218_vm8 = vmand %vm211_vm7, %vm217_vm6 }
 0x170   :  { %vm219_vm10 = vmor %vm218_vm8, %vm56_vm9 }
 0x171   :  { %v458_v26 = vpop.permute.xlu0 %457 }
 0x172   :  { %vm459_vm14 = vcmp.eq.s32.totalorder %v458_v26, 1 }
 0x238   :  { %v199_v40 = vpop.f32.mrb[0].mxu1 }
 0x239   :  { %v220_v41 = vsel %vm219_vm10, %v199_v40, -1e+30  ;;  %v633_v42 = vpop.f32.mrb[1].mxu1 }
 0x23a   :  { %v202_v43 = vpop.f32.mrb[2].mxu1  ;;  %v222_v44 = vsel %vm221_vm11, %v220_v41, -inf }
 0x23b   :  { %223 = vmax.xlane.f32.xlu1 %v222_v44  ;;  %v634_v45 = vpop.f32.mrb[3].mxu1 }
 0x2c8   :  { %v224_v46 = vpop.xlane.xlu1 %223 }
 0x2c9   :  { %v225_v47 = vsub.f32 %v220_v41, %v224_v46 }
 0x2cb   :  { %v226_v48 = vmul.f32 1.442695, %v225_v47 }
 0x2cd   :  { %701 = vpow2.f32 %v226_v48 }
 0x2d7   :  { %v702_v49 = vpop.eup %701 }
 0x2d8   :  { %v228_v50 = vsel %vm221_vm11, %v702_v49, 0.0 }
 0x2d9   :  { %229 = vadd.xlane.f32.xlu1 %v228_v50 }
 0x366   :  { %v230_v54 = vpop.xlane.xlu1 %229 }
 0x367   :  { %703 = vrcp.f32 %v230_v54 }
 0x371   :  { %v704_v55 = vpop.eup %703 }
 0x372   :  { %v232_v56 = vmul.f32 %v704_v55, %v702_v49 }
 0x374   :  { %v233_v57 = vpack.c.bf16 %v232_v56, %v232_v56 }
 0x376   :  { %638 = vmatmul.mubr.msk.bf16.vlgmr.msra.gmra.mrb[4].mxu1 %vm221_vm11, %v233_v57 }
 0x377   :  { %361 = vmatpush1.bf16.msra.mxu1 %v788_v1  ;;  %392 = vmatprep.mubr.bf16.mxu1 %v733_v2 }
 0x378   :  { %362 = vmatprep.subr.bf16.mxu1 %v796_v3 }
 0x37b   :  { %363 = vmatpush1.bf16.msra.mxu1 %v802_v4 }
 0x37c   :  { %364 = vmatprep.subr.bf16.mxu1 %v808_v5 }
 0x37f   :  { %365 = vmatpush1.bf16.msra.mxu1 %v813_v6 }
 0x380   :  { %366 = vmatprep.subr.bf16.mxu1 %v818_v7 }
 0x383   :  { %367 = vmatpush1.bf16.msra.mxu1 %v826_v8 }
 0x384   :  { %653 = vmatprep.subr.bf16.mxu1 %v734_v12 }
 0x386   :  { %607 = vmatmul.mubr.msk.bf16.vlgmr.msra.gmra.mrb[8].mxu1 %vm108_vm0, %v29_v58 }
 0x387   :  { %655 = vmatprep.mubr.msk.bf16.mxu1 %vm735_vm1, %v734_v12 }
 0x449   :  { %v276_v60 = vpop.f32.mrb[4].mxu1 }
 0x44a   :  { %v282_v61 = vpack.c.bf16 %v276_v60, %v276_v60  ;;  %v639_v62 = vpop.f32.mrb[5].mxu1 }
 0x44b   :  { %v279_v63 = vpop.f32.mrb[6].mxu1 }
 0x44c   :  { %v640_v0 = vpop.f32.mrb[7].mxu1  ;;  %650 = vmatmul.mubr.msk.bf16.vlgmr.msra.gmra.mrb[4].mxu0 %vm108_vm0, %v282_v61 }
 0x44d   :  { %666 = vmatpush3.bf16.msra.mxu0 %v697_v51  ;;  %673 = vmatprep.mubr.msk.bf16.mxu0 %vm735_vm1, %v734_v12 }
 0x44e   :  { %667 = vmatprep.subr.bf16.mxu0 %v734_v12 }
 0x451   :  { %668 = vmatpush3.bf16.msra.mxu0 %v698_v52 }
 0x452   :  { %669 = vmatprep.subr.bf16.mxu0 %v734_v12 }
 0x455   :  { %670 = vmatpush3.bf16.msra.mxu0 %v699_v53 }
 0x456   :  { %671 = vmatprep.subr.bf16.mxu0 %v734_v12 }
 0x459   :  { %v394_v1 = vpop.f32.mrb[8].mxu1  ;;  %672 = vmatpush3.bf16.msra.mxu0 %v700_v59 }
 0x45a   :  { %v395_v3 = vadd.f32 %v394_v1, %v849_v15  ;;  %v396_v4 = vpop.f32.mrb[9].mxu1  ;;  %v601_v15 = vld [vmem:[%s968_s6] ss:$0 sm:$0xff]  ;;  %s579_s6 = sshll.u32 %s737_s1, 4  ;;  %s580_s6 = int_to_ptr.vmem [resolvable:$true] %s579_s6 }
 0x45b   :  { %v398_v5 = vpop.f32.mrb[10].mxu1  ;;  %v397_v9 = vadd.f32 %v396_v4, %v862_v27  ;;  %s709_s14 = scalar_lea.vmem %s580_s6, 256  ;;  %p714_p1 = scmp.lt.s32.totalorder %s580_s6, %s580_s6 }
 0x45c   :  { %v403_v6 = vpack.c.bf16 %v395_v3, %v395_v3  ;;  %v399_v7 = vpop.f32.mrb[11].mxu1  ;;  %v401_v14 = vmul.f32 0.125, %v395_v3  ;;  %p710_p0 = scmp.ne.s32.totalorder %s580_s6, %s709_s14  ;;  %p715_p2 = scmp.lt.s32.totalorder %s709_s14, %s709_s14 }
 0x45d   :  { %v481_v16 = vpack.c.bf16 %v397_v9, %v397_v9 }
 0x45e   :  { %405 = vrot.lane.b32.xlu1 %v403_v6, %s736_s23  ;;  %v402_v17 = vpack.c.bf16 %v401_v14, %v401_v14  ;;  %p716_p3 = por %p715_p2, %p714_p1 }
 0x45f   :  { %v486_v18 = vsel %vm238_vm4, %v481_v16, 0 }
 0x460   :  { %p717_p4 = pnand %p716_p3, %p710_p0 }
 0x4d0   :  { %v406_v8 = vpop.permute.xlu1 %405 }
 0x4d1   :  { %v411_v10 = vsel %vm108_vm0, %v406_v8, 0 }
 0x4d2   :  { %654 = vmatpush3.bf16.xpose.msra.mxu1 %v411_v10 }
 0x4d3   :  { %659 = vmatprep.subr.bf16.mxu1 %v734_v12 }
 0x4d9   :  { %656 = vmatmul.mubr.msk.bf16.vlgmr.msra.gmra.mrb[12].mxu1 %vm108_vm0, %v402_v17 }
 0x4da   :  { %660 = vmatpush3.bf16.msra.mxu1 %v486_v18  ;;  %661 = vmatprep.mubr.msk.bf16.mxu1 %vm735_vm1, %v734_v12  ;;  %v464_v12 = vrot.slane %v460_v25, %v839_v13 }
 0x4dc   :  { %vm465_vm13 = vcmp.eq.s32.totalorder %v464_v12, 1 }
 0x4dd   :  { %vm466_vm15 = vmand %vm459_vm14, %vm465_vm13 }
 0x4de   :  { %vm467_vm1 = vmor %vm466_vm15, %vm56_vm9 }
 0x51f   :  { %v350_v19 = vpop.f32.mrb[4].mxu0 }
 0x520   :  { %v351_v20 = vadd.f32 %v601_v15, %v350_v19  ;;  %v651_v21 = vpop.f32.mrb[5].mxu0 }
 0x521   :  { %v353_v22 = vpop.f32.mrb[6].mxu0 }
 0x522   :  { %356 = vst.msk [vmem:[#allocation2] sm:$0xff] %vm108_vm0, %v351_v20  ;;  %v652_v23 = vpop.f32.mrb[7].mxu0 }
 0x5ac   :  { %v447_v27 = vpop.f32.mrb[12].mxu1 }
 0x5ad   :  { %v468_v28 = vsel %vm467_vm1, %v447_v27, -1e+30  ;;  %v657_v29 = vpop.f32.mrb[13].mxu1 }
 0x5ae   :  { %v450_v30 = vpop.f32.mrb[14].mxu1  ;;  %v469_v31 = vsel %vm221_vm11, %v468_v28, -inf }
 0x5af   :  { %470 = vmax.xlane.f32.xlu0 %v469_v31  ;;  %v658_v32 = vpop.f32.mrb[15].mxu1 }
 0x63c   :  { %v471_v33 = vpop.xlane.xlu0 %470 }
 0x63d   :  { %v472_v2 = vsub.f32 %v468_v28, %v471_v33 }
 0x63f   :  { %v473_v34 = vmul.f32 1.442695, %v472_v2 }
 0x641   :  { %705 = vpow2.f32 %v473_v34 }
 0x64b   :  { %v706_v13 = vpop.eup %705 }
 0x64c   :  { %v475_v35 = vsel %vm221_vm11, %v706_v13, 0.0 }
 0x64d   :  { %476 = vadd.xlane.f32.xlu1 %v475_v35 }
 0x6da   :  { %v477_v36 = vpop.xlane.xlu1 %476 }
 0x6db   :  { %707 = vrcp.f32 %v477_v36 }
 0x6e5   :  { %v708_v37 = vpop.eup %707 }
 0x6e6   :  { %v479_v11 = vmul.f32 %v708_v37, %v706_v13 }
 0x6e8   :  { %v480_v38 = vpack.c.bf16 %v479_v11, %v479_v11 }
 0x6ea   :  { %662 = vmatmul.mubr.msk.bf16.vlgmr.msra.gmra.mrb[16].mxu1 %vm221_vm11, %v480_v38 }
 0x7bd   :  { %v522_v39 = vpop.f32.mrb[16].mxu1 }
 0x7be   :  { %v528_v40 = vpack.c.bf16 %v522_v39, %v522_v39  ;;  %v663_v41 = vpop.f32.mrb[17].mxu1 }
 0x7bf   :  { %v525_v42 = vpop.f32.mrb[18].mxu1 }
 0x7c0   :  { %v664_v43 = vpop.f32.mrb[19].mxu1  ;;  %674 = vmatmul.mubr.msk.bf16.vlgmr.msra.gmra.mrb[8].mxu0 %vm108_vm0, %v528_v40 }
 0x893   :  { %v566_v44 = vpop.f32.mrb[8].mxu0 }
 0x894   :  { %v567_v45 = vadd.f32 %v601_v15, %v566_v44  ;;  %v675_v46 = vpop.f32.mrb[9].mxu0 }
 0x895   :  { %v569_v47 = vpop.f32.mrb[10].mxu0 }
 0x896   :  { %573 = vst.msk [vmem:[#allocation2 + $0x8] sm:$0xff] %vm108_vm0, %v567_v45  ;;  %v676_v48 = vpop.f32.mrb[11].mxu0 }
 0x897   :  { %720 = shalt.err (!%p717_p4)
}
 0x898   :  { %s721_s17 = scalar_lea.hbm %s969_s7, 256 }
 0x899   :  { %p722_p5 = scmp.ne.s32.totalorder %s969_s7, %s721_s17  ;;  %p725_p6 = scmp.lt.u32.totalorder %s721_s17, %s969_s7 }
 0x89b   :  { %p727_p7 = pnand %p725_p6, %p722_p5 }
 0x89d   :  { %730 = shalt.err (!%p727_p7)
}
 0x89e   :  { %s738_s21 = smov 128   ;;  %s739_s4 = smov 8  }
 0x89f   :  { %585 = dma.vmem_to_hbm [thread:$0]  %s580_s6, 256, %s969_s7, [#allocation3], %s738_s21, %s738_s21, %s739_s4  }
 0x8a0   :  { %731 = dma.done.wait [#allocation3], 256  }
 0x8a1   :  { %732 = vsyncadd [#allocation3], 4294967040 }
 0x8a2   :  { %589 = vsyncpa [#allocation3], 1 }

// kernel: att_bilstm_forward.4
= control target key start
LH: loop header
LB: loop body
LE: loop exit
PB: predicated region body
PF: predicated region fallthrough
CT: control target
= control target key end

     0   :  { %14 = vsyncpa [#allocation5], 0  ;;  %v1480_v2 = vmov 0   ;;  %vm72_vm0 = vcmask 261120   ;;  %s1481_s29 = smov 64   ;;  %s1910_s0 = inlined_call_operand.vmem [shape: bf16[16,32], index: 0, kind: input, shape index: {}]   ;;  %s1911_s1 = inlined_call_operand.vmem [shape: bf16[32,256], index: 1, kind: input, shape index: {}]   ;;  %s1912_s2 = inlined_call_operand.vmem [shape: bf16[64,256], index: 2, kind: input, shape index: {}]   ;;  %s1913_s3 = inlined_call_operand.vmem [shape: f32[1,256], index: 3, kind: input, shape index: {}]   ;;  %s1914_s4 = inlined_call_operand.vmem [shape: f32[2,64], index: 4, kind: input, shape index: {}]   ;;  %s1915_s5 = inlined_call_operand.vmem [shape: f32[2,64], index: 5, kind: input, shape index: {}]   ;;  %s1916_s6 = inlined_call_operand.vmem [shape: bf16[2,8,64], index: 6, kind: output, shape index: {0}]   ;;  %s1917_s7 = inlined_call_operand.hbm [shape: f32[2,2,32], index: 7, kind: output, shape index: {1}]   ;;  %s1918_s8 = inlined_call_operand.hbm [shape: f32[2,2,32], index: 8, kind: output, shape index: {2}]  }
   0x1   :  { %v1317_v0 = vld [vmem:[%s1911_s1 + $0x4] ss:$8 sps:$4 sm:$0xff]   ;;  %108 = vmatprep.mubr.bf16.mxu0 %v1480_v2  ;;  %270 = vmatprep.mubr.bf16.mxu1 %v1480_v2  ;;  %v1321_v3 = vld [vmem:[%s1911_s1] ss:$8 sps:$4 sm:$0xff]   ;;  %v1323_v5 = vld [vmem:[%s1911_s1 + $0x14] ss:$8 sps:$4 sm:$0xff]  }
   0x2   :  { %v1539_v1 = vld [vmem:[%s1912_s2 + $0x4] ss:$8 sps:$4 sm:$0xff]   ;;  %76 = vmatprep.subr.bf16.mxu0 %v1317_v0  ;;  %v1549_v4 = vld [vmem:[%s1912_s2] ss:$8 sps:$4 sm:$0xff]   ;;  %v1559_v6 = vld [vmem:[%s1912_s2 + $0x14] ss:$8 sps:$4 sm:$0xff]  }
   0x3   :  { %238 = vmatprep.subr.bf16.mxu1 %v1539_v1  ;;  %77 = vmatpush1.bf16.msra.mxu0 %v1321_v3  ;;  %v1327_v7 = vld [vmem:[%s1911_s1 + $0x10] ss:$8 sps:$4 sm:$0xff]   ;;  %v1329_v9 = vld [vmem:[%s1910_s0] sm:$0xff]   ;;  %v1588_v12 = vld [vmem:[%s1912_s2 + $0x34] ss:$8 sps:$4 sm:$0xff]  }
   0x4   :  { %239 = vmatpush1.bf16.msra.mxu1 %v1549_v4  ;;  %78 = vmatprep.subr.bf16.mxu0 %v1323_v5  ;;  %v1567_v8 = vld [vmem:[%s1912_s2 + $0x10] ss:$8 sps:$4 sm:$0xff]   ;;  %v1576_v10 = vld [vmem:[%s1912_s2 + $0x24] ss:$8 sps:$4 sm:$0xff]   ;;  %v1582_v11 = vld [vmem:[%s1912_s2 + $0x20] ss:$8 sps:$4 sm:$0xff]  }
   0x5   :  { %240 = vmatprep.subr.bf16.mxu1 %v1559_v6  ;;  %v1254_v13 = vld.sshfl [vmem:[%s1915_s5] sm:$0x3 pattern:$0x76325410] }
   0x6   :  { %319 = vrot.lane.b32.xlu0 %v1254_v13, %s1481_s29 }
   0x7   :  { %79 = vmatpush1.bf16.msra.mxu0 %v1327_v7 }
   0x8   :  { %241 = vmatpush1.bf16.msra.mxu1 %v1567_v8  ;;  %342 = vmatprep.subr.bf16.mxu0 %v1539_v1 }
   0x9   :  { %242 = vmatprep.subr.bf16.mxu1 %v1576_v10 }
   0xa   :  { %15 = vsyncpa [#allocation7], 0  ;;  %1238 = vmatmul.mubr.msk.bf16.vlgmr.msra.gmra.mrb[0].mxu0 %vm72_vm0, %v1329_v9  ;;  %v1600_v14 = vld [vmem:[%s1912_s2 + $0x30] ss:$8 sps:$4 sm:$0xff]   ;;  %v190_v15 = vld [vmem:[%s1914_s4] sm:$0x3]  ;;  %v37_v17 = vlaneseq }
   0xb   :  { %343 = vmatpush1.bf16.msra.mxu0 %v1549_v4  ;;  %374 = vmatprep.mubr.bf16.mxu0 %v1480_v2  ;;  %v193_v16 = vpack.c.bf16 %v190_v15, %v190_v15  ;;  %vm234_vm1 = vcmask 523264   ;;  %v35_v20 = vld [vmem:[%s1913_s3] sm:$0x3]  ;;  %v1482_v21 = vmov 1983009808   ;;  %vm335_vm2 = vcmask 517120  }
   0xc   :  { %243 = vmatpush1.bf16.msra.mxu1 %v1582_v11  ;;  %344 = vmatprep.subr.bf16.mxu0 %v1559_v6  ;;  %v38_v18 = vshrl.u32 %v37_v17, 7  ;;  %v123_v22 = vunpack.c.l.s4 %v1482_v21  ;;  %vm1116_vm3 = vcmask 518146   ;;  %vm1117_vm4 = vsmask.f32 2304  ;;  %s1484_s23 = smov 32   ;;  %s1485_s21 = smov [#allocation4]  }
   0xd   :  { %244 = vmatprep.subr.bf16.mxu1 %v1588_v12  ;;  %vm1118_vm5 = vmand %vm1116_vm3, %vm1117_vm4  ;;  %vm1071_vm6 = vcmask 517121   ;;  %vm1072_vm7 = vsmask.f32 1280  ;;  %vm1142_vm8 = vsmask.f32 7946  ;;  %vm1161_vm13 = vcmask 519171  }
   0xe   :  { %v39_v19 = vsub.s32 0, %v38_v18  ;;  %v43_v23 = vsub.s32 1, %v38_v18  ;;  %v124_v25 = vunpack.c.0.s8 %v123_v22  ;;  %vm1736_vm9 = vmand %vm1071_vm6, %vm1072_vm7  ;;  %vm1097_vm11 = vsmask.f32 7942  ;;  %s1204_s22 = sshll.u32 %s1485_s21, 4  ;;  %s1205_s22 = int_to_ptr.vmem [resolvable:$true] %s1204_s22 }
   0xf   :  { %345 = vmatpush1.bf16.msra.mxu0 %v1567_v8  ;;  %vm1744_vm10 = vmand %vm1116_vm3, %vm1142_vm8  ;;  %vm1162_vm14 = vsmask.f32 3328  ;;  %vm1024_vm3 = vcmask 516096   ;;  %vm1025_vm4 = vsmask.f32 256  ;;  %s1432_s1 = scalar_lea.vmem %s1205_s22, 64  ;;  %p1437_p1 = scmp.lt.s32.totalorder %s1205_s22, %s1205_s22 }
  0x10   :  { %245 = vmatpush1.bf16.msra.mxu1 %v1600_v14  ;;  %346 = vmatprep.subr.bf16.mxu0 %v1576_v10  ;;  %v40_v24 = vrot.slane %v35_v20, %v39_v19  ;;  %v44_v26 = vrot.slane %v35_v20, %v43_v23  ;;  %v1630_v30 = vsub.s32 %v124_v25, %v38_v18  ;;  %vm1098_vm12 = vmand %vm1071_vm6, %vm1097_vm11  ;;  %p1433_p0 = scmp.ne.s32.totalorder %s1205_s22, %s1432_s1  ;;  %p1438_p2 = scmp.lt.s32.totalorder %s1432_s1, %s1432_s1 }
  0x11   :  { %435 = vmatprep.subr.bf16.mxu1 %v1539_v1  ;;  %vm1163_vm15 = vmand %vm1161_vm13, %vm1162_vm14 }
  0x12   :  { %p1439_p3 = por %p1438_p2, %p1437_p1 }
  0x13   :  { %1251 = vmatmul.mubr.msk.bf16.vlgmr.msra.gmra.mrb[0].mxu1 %vm234_vm1, %v193_v16  ;;  %347 = vmatpush1.bf16.msra.mxu0 %v1582_v11 }
  0x14   :  { %436 = vmatpush1.bf16.msra.mxu1 %v1549_v4  ;;  %348 = vmatprep.subr.bf16.mxu0 %v1588_v12  ;;  %p1440_p4 = pnand %p1439_p3, %p1433_p0 }
  0x15   :  { %437 = vmatprep.subr.bf16.mxu1 %v1559_v6  ;;  %467 = vmatprep.mubr.bf16.mxu1 %v1480_v2 }
  0x17   :  { %349 = vmatpush1.bf16.msra.mxu0 %v1600_v14 }
  0x18   :  { %438 = vmatpush1.bf16.msra.mxu1 %v1567_v8  ;;  %528 = vmatprep.subr.bf16.mxu0 %v1539_v1 }
  0x19   :  { %439 = vmatprep.subr.bf16.mxu1 %v1576_v10 }
  0x1c   :  { %440 = vmatpush1.bf16.msra.mxu1 %v1582_v11 }
  0x1d   :  { %441 = vmatprep.subr.bf16.mxu1 %v1588_v12 }
  0x20   :  { %442 = vmatpush1.bf16.msra.mxu1 %v1600_v14 }
  0x21   :  { %621 = vmatprep.subr.bf16.mxu1 %v1539_v1 }
  0x78   :  { %v320_v63 = vpop.permute.xlu0 %319 }
  0xdd   :  { %v110_v27 = vpop.f32.mrb[0].mxu0 }
  0xde   :  { %v111_v28 = vadd.f32 %v110_v27, %v40_v24  ;;  %v112_v29 = vpop.f32.mrb[1].mxu0 }
  0xdf   :  { %v113_v31 = vadd.f32 %v112_v29, %v44_v26  ;;  %v114_v32 = vpop.f32.mrb[2].mxu0 }
  0xe0   :  { %v115_v33 = vadd.f32 %v114_v32, %v40_v24  ;;  %v116_v34 = vpop.f32.mrb[3].mxu0 }
  0xe1   :  { %v121_v35 = vcombine.low %v111_v28, %v113_v31  ;;  %v135_v36 = vcombine.high %v111_v28, %v113_v31  ;;  %v117_v37 = vadd.f32 %v116_v34, %v44_v26 }
  0xe3   :  { %v128_v38 = vrot.slane %v121_v35, %v1630_v30  ;;  %1239 = vst.sshfl [vmem:[#allocation2] sm:$0x33 pattern:$0x76325410] %v121_v35  ;;  %v142_v39 = vrot.slane %v135_v36, %v1630_v30  ;;  %v152_v40 = vcombine.low %v115_v33, %v117_v37  ;;  %v167_v41 = vcombine.high %v115_v33, %v117_v37 }
  0xe4   :  { %1240 = vst.sshfl [vmem:[#allocation2 + $0x8] sm:$0x33 pattern:$0x76325410] %v135_v36 }
  0xe5   :  { %v131_v42 = vcombine.high %v128_v38, %v128_v38  ;;  %v146_v43 = vcombine.high %v142_v39, %v142_v39  ;;  %v159_v44 = vrot.slane %v152_v40, %v1630_v30  ;;  %1241 = vst.sshfl [vmem:[#allocation2 + $0x10] sm:$0x33 pattern:$0x76325410] %v152_v40  ;;  %v174_v45 = vrot.slane %v167_v41, %v1630_v30 }
  0xe6   :  { %1242 = vst.sshfl [vmem:[#allocation2 + $0x18] sm:$0x33 pattern:$0x76325410] %v167_v41  ;;  %v272_v46 = vpop.f32.mrb[0].mxu1 }
  0xe7   :  { %v274_v47 = vpop.f32.mrb[1].mxu1  ;;  %134 = vst [vmem:[#allocation2 + $0x4] sm:$0xf] %v131_v42  ;;  %149 = vst [vmem:[#allocation2 + $0xc] sm:$0xf] %v146_v43  ;;  %v163_v48 = vcombine.high %v159_v44, %v159_v44  ;;  %v178_v49 = vcombine.high %v174_v45, %v174_v45 }
  0xe8   :  { %v281_v50 = vcombine.low %v272_v46, %v274_v47  ;;  %v276_v51 = vpop.f32.mrb[2].mxu1 }
  0xe9   :  { %v277_v52 = vpop.f32.mrb[3].mxu1  ;;  %166 = vst [vmem:[#allocation2 + $0x14] sm:$0xf] %v163_v48  ;;  %181 = vst [vmem:[#allocation2 + $0x1c] sm:$0xf] %v178_v49 }
  0xea   :  { %v288_v53 = vrot.slane %v281_v50, %v1630_v30  ;;  %v192_v54 = vld [vmem:[#allocation2] sm:$0xf] }
  0xec   :  { %v290_v55 = vadd.f32 %v288_v53, %v192_v54 }
  0xee   :  { %301 = vrot.lane.b32.xlu1 %v290_v55, %s1481_s29  ;;  %v1252_v56 = vmul.f32 -1.442695, %v290_v55  ;;  %v298_v57 = vrot.slane %v290_v55, 2  ;;  %v337_v28 = vld [vmem:[#allocation2 + $0x4] sm:$0xf] }
  0xf0   :  { %1336 = vpow2.f32 %v1252_v56 }
  0xf1   :  { %1338 = vtanh.f32 %v298_v57  ;;  %v430_v57 = vld [vmem:[#allocation2 + $0x8] sm:$0xf] }
  0xfa   :  { %v1337_v58 = vpop.eup %1336 }
  0xfb   :  { %v294_v59 = vadd.f32 1.0, %v1337_v58  ;;  %v1339_v60 = vpop.eup %1338 }
  0xfd   :  { %1340 = vrcp.f32 %v294_v59 }
 0x107   :  { %v1341_v61 = vpop.eup %1340 }
 0x108   :  { %v323_v62 = vmul.f32 %v1341_v61, %v1339_v60  ;;  %v322_v0 = vmul.f32 %v1341_v61, %v320_v63 }
 0x10a   :  { %325 = vrot.lane.b32.xlu0 %v323_v62, %s1481_s29 }
 0x160   :  { %v302_v9 = vpop.permute.xlu1 %301 }
 0x161   :  { %v303_v13 = vrot.slane %v302_v9, 2 }
 0x163   :  { %v1253_v15 = vmul.f32 -1.442695, %v303_v13 }
 0x17c   :  { %v326_v3 = vpop.permute.xlu0 %325 }
 0x17d   :  { %v328_v5 = vadd.f32 %v326_v3, %v322_v0 }
 0x17f   :  { %1342 = vtanh.f32 %v328_v5 }
 0x180   :  { %1344 = vpow2.f32 %v1253_v15 }
 0x189   :  { %v1343_v7 = vpop.eup %1342 }
 0x18a   :  { %331 = vrot.lane.b32.xlu1 %v1343_v7, %s1481_s29  ;;  %v1345_v16 = vpop.eup %1344 }
 0x18b   :  { %v308_v17 = vadd.f32 1.0, %v1345_v16 }
 0x18d   :  { %1346 = vrcp.f32 %v308_v17 }
 0x197   :  { %v1347_v18 = vpop.eup %1346 }
 0x1fc   :  { %v332_v19 = vpop.permute.xlu1 %331 }
 0x1fd   :  { %v334_v20 = vmul.f32 %v1347_v18, %v332_v19 }
 0x1ff   :  { %336 = vst.msk [vmem:[#allocation3] sm:$0x3] %vm335_vm2, %v334_v20  ;;  %v338_v21 = vpack.c.bf16 %v334_v20, %v334_v20 }
 0x201   :  { %1255 = vmatmul.mubr.msk.bf16.vlgmr.msra.gmra.mrb[4].mxu0 %vm234_vm1, %v338_v21 }
 0x202   :  { %529 = vmatpush1.bf16.msra.mxu0 %v1549_v4  ;;  %560 = vmatprep.mubr.bf16.mxu0 %v1480_v2 }
 0x203   :  { %530 = vmatprep.subr.bf16.mxu0 %v1559_v6 }
 0x206   :  { %531 = vmatpush1.bf16.msra.mxu0 %v1567_v8 }
 0x207   :  { %532 = vmatprep.subr.bf16.mxu0 %v1576_v10 }
 0x20a   :  { %533 = vmatpush1.bf16.msra.mxu0 %v1582_v11 }
 0x20b   :  { %534 = vmatprep.subr.bf16.mxu0 %v1588_v12 }
 0x20e   :  { %535 = vmatpush1.bf16.msra.mxu0 %v1600_v14 }
 0x20f   :  { %714 = vmatprep.subr.bf16.mxu0 %v1539_v1 }
 0x2d4   :  { %v376_v22 = vpop.f32.mrb[4].mxu0 }
 0x2d5   :  { %v378_v23 = vpop.f32.mrb[5].mxu0 }
 0x2d6   :  { %v385_v24 = vcombine.low %v376_v22, %v378_v23  ;;  %v380_v25 = vpop.f32.mrb[6].mxu0 }
 0x2d7   :  { %v381_v26 = vpop.f32.mrb[7].mxu0 }
 0x2d8   :  { %v392_v27 = vrot.slane %v385_v24, %v1630_v30 }
 0x2da   :  { %v394_v29 = vadd.f32 %v392_v27, %v337_v28 }
 0x2dc   :  { %405 = vrot.lane.b32.xlu1 %v394_v29, %s1481_s29  ;;  %v1256_v31 = vmul.f32 -1.442695, %v394_v29  ;;  %v402_v32 = vrot.slane %v394_v29, 2 }
 0x2de   :  { %1348 = vpow2.f32 %v1256_v31  ;;  %v523_v31 = vld [vmem:[#allocation2 + $0xc] sm:$0xf] }
 0x2df   :  { %1350 = vtanh.f32 %v402_v32 }
 0x2e8   :  { %v1349_v33 = vpop.eup %1348 }
 0x2e9   :  { %v398_v34 = vadd.f32 1.0, %v1349_v33  ;;  %v1351_v35 = vpop.eup %1350 }
 0x2eb   :  { %1352 = vrcp.f32 %v398_v34 }
 0x2f5   :  { %v1353_v36 = vpop.eup %1352 }
 0x2f6   :  { %v416_v37 = vmul.f32 %v1353_v36, %v1351_v35  ;;  %v415_v38 = vmul.f32 %v1353_v36, %v328_v5 }
 0x2f8   :  { %418 = vrot.lane.b32.xlu0 %v416_v37, %s1481_s29 }
 0x34e   :  { %v406_v42 = vpop.permute.xlu1 %405 }
 0x34f   :  { %v407_v43 = vrot.slane %v406_v42, 2 }
 0x351   :  { %v1257_v44 = vmul.f32 -1.442695, %v407_v43 }
 0x36a   :  { %v419_v39 = vpop.permute.xlu0 %418 }
 0x36b   :  { %v421_v40 = vadd.f32 %v419_v39, %v415_v38 }
 0x36d   :  { %1354 = vtanh.f32 %v421_v40 }
 0x36e   :  { %1356 = vpow2.f32 %v1257_v44 }
 0x377   :  { %v1355_v41 = vpop.eup %1354 }
 0x378   :  { %424 = vrot.lane.b32.xlu0 %v1355_v41, %s1481_s29  ;;  %v1357_v45 = vpop.eup %1356 }
 0x379   :  { %v412_v46 = vadd.f32 1.0, %v1357_v45 }
 0x37b   :  { %1358 = vrcp.f32 %v412_v46 }
 0x385   :  { %v1359_v47 = vpop.eup %1358 }
 0x3ea   :  { %v425_v48 = vpop.permute.xlu0 %424 }
 0x3eb   :  { %v427_v49 = vmul.f32 %v1359_v47, %v425_v48 }
 0x3ed   :  { %429 = vst.msk [vmem:[#allocation3 + $0x2] sm:$0x3] %vm335_vm2, %v427_v49  ;;  %v431_v50 = vpack.c.bf16 %v427_v49, %v427_v49 }
 0x3ef   :  { %1258 = vmatmul.mubr.msk.bf16.vlgmr.msra.gmra.mrb[4].mxu1 %vm234_vm1, %v431_v50 }
 0x3f0   :  { %622 = vmatpush1.bf16.msra.mxu1 %v1549_v4  ;;  %653 = vmatprep.mubr.bf16.mxu1 %v1480_v2 }
 0x3f1   :  { %623 = vmatprep.subr.bf16.mxu1 %v1559_v6 }
 0x3f4   :  { %624 = vmatpush1.bf16.msra.mxu1 %v1567_v8 }
 0x3f5   :  { %625 = vmatprep.subr.bf16.mxu1 %v1576_v10 }
 0x3f8   :  { %626 = vmatpush1.bf16.msra.mxu1 %v1582_v11 }
 0x3f9   :  { %627 = vmatprep.subr.bf16.mxu1 %v1588_v12 }
 0x3fc   :  { %628 = vmatpush1.bf16.msra.mxu1 %v1600_v14 }
 0x3fd   :  { %807 = vmatprep.subr.bf16.mxu1 %v1539_v1 }
 0x4c2   :  { %v469_v51 = vpop.f32.mrb[4].mxu1 }
 0x4c3   :  { %v471_v52 = vpop.f32.mrb[5].mxu1 }
 0x4c4   :  { %v478_v53 = vcombine.low %v469_v51, %v471_v52  ;;  %v473_v54 = vpop.f32.mrb[6].mxu1 }
 0x4c5   :  { %v474_v55 = vpop.f32.mrb[7].mxu1 }
 0x4c6   :  { %v485_v56 = vrot.slane %v478_v53, %v1630_v30 }
 0x4c8   :  { %v487_v58 = vadd.f32 %v485_v56, %v430_v57 }
 0x4ca   :  { %498 = vrot.lane.b32.xlu0 %v487_v58, %s1481_s29  ;;  %v1259_v59 = vmul.f32 -1.442695, %v487_v58  ;;  %v495_v60 = vrot.slane %v487_v58, 2  ;;  %v616_v58 = vld [vmem:[#allocation2 + $0x10] sm:$0xf] }
 0x4cc   :  { %1360 = vpow2.f32 %v1259_v59 }
 0x4cd   :  { %1362 = vtanh.f32 %v495_v60 }
 0x4d6   :  { %v1361_v61 = vpop.eup %1360 }
 0x4d7   :  { %v491_v62 = vadd.f32 1.0, %v1361_v61  ;;  %v1363_v63 = vpop.eup %1362 }
 0x4d9   :  { %1364 = vrcp.f32 %v491_v62 }
 0x4e3   :  { %v1365_v0 = vpop.eup %1364 }
 0x4e4   :  { %v509_v3 = vmul.f32 %v1365_v0, %v1363_v63  ;;  %v508_v5 = vmul.f32 %v1365_v0, %v421_v40 }
 0x4e6   :  { %511 = vrot.lane.b32.xlu1 %v509_v3, %s1481_s29 }
 0x53c   :  { %v499_v15 = vpop.permute.xlu0 %498 }
 0x53d   :  { %v500_v16 = vrot.slane %v499_v15, 2 }
 0x53f   :  { %v1260_v17 = vmul.f32 -1.442695, %v500_v16 }
 0x558   :  { %v512_v7 = vpop.permute.xlu1 %511 }
 0x559   :  { %v514_v9 = vadd.f32 %v512_v7, %v508_v5 }
 0x55b   :  { %1366 = vtanh.f32 %v514_v9 }
 0x55c   :  { %1368 = vpow2.f32 %v1260_v17 }
 0x565   :  { %v1367_v13 = vpop.eup %1366 }
 0x566   :  { %517 = vrot.lane.b32.xlu1 %v1367_v13, %s1481_s29  ;;  %v1369_v18 = vpop.eup %1368 }
 0x567   :  { %v505_v19 = vadd.f32 1.0, %v1369_v18 }
 0x569   :  { %1370 = vrcp.f32 %v505_v19 }
 0x573   :  { %v1371_v20 = vpop.eup %1370 }
 0x5d8   :  { %v518_v21 = vpop.permute.xlu1 %517 }
 0x5d9   :  { %v520_v22 = vmul.f32 %v1371_v20, %v518_v21 }
 0x5db   :  { %522 = vst.msk [vmem:[#allocation3 + $0x4] sm:$0x3] %vm335_vm2, %v520_v22  ;;  %v524_v23 = vpack.c.bf16 %v520_v22, %v520_v22 }
 0x5dd   :  { %1261 = vmatmul.mubr.msk.bf16.vlgmr.msra.gmra.mrb[8].mxu0 %vm234_vm1, %v524_v23 }
 0x5de   :  { %715 = vmatpush1.bf16.msra.mxu0 %v1549_v4  ;;  %746 = vmatprep.mubr.bf16.mxu0 %v1480_v2 }
 0x5df   :  { %716 = vmatprep.subr.bf16.mxu0 %v1559_v6 }
 0x5e2   :  { %717 = vmatpush1.bf16.msra.mxu0 %v1567_v8 }
 0x5e3   :  { %718 = vmatprep.subr.bf16.mxu0 %v1576_v10 }
 0x5e6   :  { %719 = vmatpush1.bf16.msra.mxu0 %v1582_v11 }
 0x5e7   :  { %720 = vmatprep.subr.bf16.mxu0 %v1588_v12 }
 0x5ea   :  { %721 = vmatpush1.bf16.msra.mxu0 %v1600_v14 }
 0x5eb   :  { %900 = vmatprep.subr.bf16.mxu0 %v1539_v1 }
 0x6b0   :  { %v562_v24 = vpop.f32.mrb[8].mxu0 }
 0x6b1   :  { %v564_v25 = vpop.f32.mrb[9].mxu0 }
 0x6b2   :  { %v571_v26 = vcombine.low %v562_v24, %v564_v25  ;;  %v566_v27 = vpop.f32.mrb[10].mxu0 }
 0x6b3   :  { %v567_v28 = vpop.f32.mrb[11].mxu0 }
 0x6b4   :  { %v578_v29 = vrot.slane %v571_v26, %v1630_v30 }
 0x6b6   :  { %v580_v32 = vadd.f32 %v578_v29, %v523_v31 }
 0x6b8   :  { %591 = vrot.lane.b32.xlu1 %v580_v32, %s1481_s29  ;;  %v1262_v33 = vmul.f32 -1.442695, %v580_v32  ;;  %v588_v34 = vrot.slane %v580_v32, 2 }
 0x6ba   :  { %1372 = vpow2.f32 %v1262_v33 }
 0x6bb   :  { %1374 = vtanh.f32 %v588_v34 }
 0x6c4   :  { %v1373_v35 = vpop.eup %1372 }
 0x6c5   :  { %v584_v36 = vadd.f32 1.0, %v1373_v35  ;;  %v1375_v37 = vpop.eup %1374 }
 0x6c7   :  { %1376 = vrcp.f32 %v584_v36  ;;  %v709_v36 = vld [vmem:[#allocation2 + $0x14] sm:$0xf] }
 0x6d1   :  { %v1377_v1 = vpop.eup %1376 }
 0x6d2   :  { %v602_v38 = vmul.f32 %v1377_v1, %v1375_v37  ;;  %v601_v39 = vmul.f32 %v1377_v1, %v514_v9 }
 0x6d4   :  { %604 = vrot.lane.b32.xlu0 %v602_v38, %s1481_s29 }
 0x72a   :  { %v592_v43 = vpop.permute.xlu1 %591 }
 0x72b   :  { %v593_v44 = vrot.slane %v592_v43, 2 }
 0x72d   :  { %v1263_v45 = vmul.f32 -1.442695, %v593_v44 }
 0x746   :  { %v605_v40 = vpop.permute.xlu0 %604 }
 0x747   :  { %v607_v41 = vadd.f32 %v605_v40, %v601_v39 }
 0x749   :  { %1378 = vtanh.f32 %v607_v41 }
 0x74a   :  { %1380 = vpow2.f32 %v1263_v45 }
 0x753   :  { %v1379_v42 = vpop.eup %1378 }
 0x754   :  { %610 = vrot.lane.b32.xlu0 %v1379_v42, %s1481_s29  ;;  %v1381_v46 = vpop.eup %1380 }
 0x755   :  { %v598_v47 = vadd.f32 1.0, %v1381_v46 }
 0x757   :  { %1382 = vrcp.f32 %v598_v47 }
 0x761   :  { %v1383_v48 = vpop.eup %1382 }
 0x7c6   :  { %v611_v49 = vpop.permute.xlu0 %610 }
 0x7c7   :  { %v613_v50 = vmul.f32 %v1383_v48, %v611_v49 }
 0x7c9   :  { %615 = vst.msk [vmem:[#allocation3 + $0x6] sm:$0x3] %vm335_vm2, %v613_v50  ;;  %v617_v51 = vpack.c.bf16 %v613_v50, %v613_v50 }
 0x7cb   :  { %1264 = vmatmul.mubr.msk.bf16.vlgmr.msra.gmra.mrb[8].mxu1 %vm234_vm1, %v617_v51 }
 0x7cc   :  { %808 = vmatpush1.bf16.msra.mxu1 %v1549_v4  ;;  %839 = vmatprep.mubr.bf16.mxu1 %v1480_v2 }
 0x7cd   :  { %809 = vmatprep.subr.bf16.mxu1 %v1559_v6 }
 0x7d0   :  { %810 = vmatpush1.bf16.msra.mxu1 %v1567_v8  ;;  %v1108_v25 = vld [vmem:[#allocation3 + $0x6] sm:$0x3] }
 0x7d1   :  { %811 = vmatprep.subr.bf16.mxu1 %v1576_v10 }
 0x7d4   :  { %812 = vmatpush1.bf16.msra.mxu1 %v1582_v11 }
 0x7d5   :  { %813 = vmatprep.subr.bf16.mxu1 %v1588_v12 }
 0x7d8   :  { %814 = vmatpush1.bf16.msra.mxu1 %v1600_v14 }
 0x89e   :  { %v655_v52 = vpop.f32.mrb[8].mxu1 }
 0x89f   :  { %v657_v53 = vpop.f32.mrb[9].mxu1 }
 0x8a0   :  { %v664_v54 = vcombine.low %v655_v52, %v657_v53  ;;  %v659_v55 = vpop.f32.mrb[10].mxu1 }
 0x8a1   :  { %v660_v56 = vpop.f32.mrb[11].mxu1 }
 0x8a2   :  { %v671_v57 = vrot.slane %v664_v54, %v1630_v30  ;;  %v1062_v56 = vld [vmem:[#allocation3 + $0x4] sm:$0x3] }
 0x8a4   :  { %v673_v59 = vadd.f32 %v671_v57, %v616_v58  ;;  %v1131_v57 = vld [vmem:[#allocation3 + $0x4] sm:$0x3] }
 0x8a6   :  { %684 = vrot.lane.b32.xlu0 %v673_v59, %s1481_s29  ;;  %v1265_v60 = vmul.f32 -1.442695, %v673_v59  ;;  %v681_v61 = vrot.slane %v673_v59, 2 }
 0x8a8   :  { %1384 = vpow2.f32 %v1265_v60 }
 0x8a9   :  { %1386 = vtanh.f32 %v681_v61  ;;  %v1085_v61 = vld [vmem:[#allocation3 + $0x6] sm:$0x3] }
 0x8b2   :  { %v1385_v62 = vpop.eup %1384 }
 0x8b3   :  { %v677_v63 = vadd.f32 1.0, %v1385_v62  ;;  %v1387_v0 = vpop.eup %1386 }
 0x8b5   :  { %1388 = vrcp.f32 %v677_v63 }
 0x8bf   :  { %v1389_v3 = vpop.eup %1388 }
 0x8c0   :  { %v695_v5 = vmul.f32 %v1389_v3, %v1387_v0  ;;  %v694_v7 = vmul.f32 %v1389_v3, %v607_v41 }
 0x8c2   :  { %697 = vrot.lane.b32.xlu1 %v695_v5, %s1481_s29 }
 0x918   :  { %v685_v16 = vpop.permute.xlu0 %684 }
 0x919   :  { %v686_v17 = vrot.slane %v685_v16, 2 }
 0x91b   :  { %v1266_v18 = vmul.f32 -1.442695, %v686_v17 }
 0x934   :  { %v698_v9 = vpop.permute.xlu1 %697 }
 0x935   :  { %v700_v13 = vadd.f32 %v698_v9, %v694_v7  ;;  %v1074_v9 = vld [vmem:[%s1916_s6] sm:$0x2] }
 0x937   :  { %1390 = vtanh.f32 %v700_v13 }
 0x938   :  { %1392 = vpow2.f32 %v1266_v18 }
 0x941   :  { %v1391_v15 = vpop.eup %1390 }
 0x942   :  { %703 = vrot.lane.b32.xlu1 %v1391_v15, %s1481_s29  ;;  %v1393_v19 = vpop.eup %1392 }
 0x943   :  { %v691_v20 = vadd.f32 1.0, %v1393_v19 }
 0x945   :  { %1394 = vrcp.f32 %v691_v20  ;;  %v1284_v20 = vld [vmem:[%s1916_s6 + $0x4] sm:$0x2] }
 0x94f   :  { %v1395_v21 = vpop.eup %1394 }
 0x9b4   :  { %v704_v22 = vpop.permute.xlu1 %703 }
 0x9b5   :  { %v706_v23 = vmul.f32 %v1395_v21, %v704_v22 }
 0x9b7   :  { %708 = vst.msk [vmem:[#allocation3 + $0x8] sm:$0x3] %vm335_vm2, %v706_v23  ;;  %v710_v24 = vpack.c.bf16 %v706_v23, %v706_v23 }
 0x9b9   :  { %1267 = vmatmul.mubr.msk.bf16.vlgmr.msra.gmra.mrb[12].mxu0 %vm234_vm1, %v710_v24 }
 0x9ba   :  { %901 = vmatpush1.bf16.msra.mxu0 %v1549_v4  ;;  %932 = vmatprep.mubr.bf16.mxu0 %v1480_v2  ;;  %v1119_v4 = vld [vmem:[%s1916_s6] sm:$0x4] }
 0x9bb   :  { %902 = vmatprep.subr.bf16.mxu0 %v1559_v6  ;;  %v1290_v6 = vld [vmem:[%s1916_s6 + $0x4] sm:$0x4] }
 0x9be   :  { %v1107_v26 = vld [vmem:[#allocation3 + $0x8] sm:$0x3]  ;;  %903 = vmatpush1.bf16.msra.mxu0 %v1567_v8 }
 0x9bf   :  { %v1109_v27 = vsel %vm72_vm0, %v1107_v26, %v1108_v25  ;;  %904 = vmatprep.subr.bf16.mxu0 %v1576_v10  ;;  %v1086_v58 = vld [vmem:[#allocation3 + $0x8] sm:$0x3] }
 0x9c0   :  { %v1305_v28 = vpack.c.bf16 %v1109_v27, %v1109_v27  ;;  %v1087_v0 = vsel %vm72_vm0, %v1085_v61, %v1086_v58 }
 0x9c1   :  { %v1304_v19 = vpack.c.bf16 %v1087_v0, %v1087_v0 }
 0x9c2   :  { %v1114_v2 = vrot.slane %v1305_v28, 6  ;;  %v1123_v29 = vshrl.u32 %v1305_v28, 16  ;;  %905 = vmatpush1.bf16.msra.mxu0 %v1582_v11 }
 0x9c3   :  { %906 = vmatprep.subr.bf16.mxu0 %v1588_v12 }
 0x9c4   :  { %v1120_v8 = vsel %vm1118_vm5, %v1114_v2, %v1119_v4  ;;  %v1125_v31 = vrot.slane %v1123_v29, 6  ;;  %v1093_v4 = vshll.u32 %v1304_v19, 16 }
 0x9c5   :  { %1121 = vst [vmem:[%s1916_s6] sm:$0x4] %v1120_v8 }
 0x9c6   :  { %v1128_v10 = vsel %vm1118_vm5, %v1125_v31, %v1290_v6  ;;  %907 = vmatpush1.bf16.msra.mxu0 %v1600_v14  ;;  %v1095_v2 = vrot.slane %v1093_v4, 7  ;;  %v1102_v6 = vrot.slane %v1304_v19, 7  ;;  %vm1187_vm5 = vsmask.f32 7950 }
 0x9c7   :  { %1291 = vst [vmem:[%s1916_s6 + $0x4] sm:$0x4] %v1128_v10  ;;  %vm1833_vm6 = vmand %vm1161_vm13, %vm1187_vm5 }
 0x9cc   :  { %v1144_v26 = vld [vmem:[%s1916_s6] sm:$0x4] }
 0x9ce   :  { %v1293_v21 = vld [vmem:[%s1916_s6 + $0x4] sm:$0x4] }
 0xa8c   :  { %v748_v11 = vpop.f32.mrb[12].mxu0 }
 0xa8d   :  { %v750_v32 = vpop.f32.mrb[13].mxu0 }
 0xa8e   :  { %v757_v33 = vcombine.low %v748_v11, %v750_v32  ;;  %v752_v34 = vpop.f32.mrb[14].mxu0 }
 0xa8f   :  { %v753_v35 = vpop.f32.mrb[15].mxu0 }
 0xa90   :  { %v764_v12 = vrot.slane %v757_v33, %v1630_v30 }
 0xa92   :  { %v766_v37 = vadd.f32 %v764_v12, %v709_v36  ;;  %v802_v36 = vld [vmem:[#allocation2 + $0x18] sm:$0xf] }
 0xa94   :  { %777 = vrot.lane.b32.xlu1 %v766_v37, %s1481_s29  ;;  %v1268_v1 = vmul.f32 -1.442695, %v766_v37  ;;  %v774_v38 = vrot.slane %v766_v37, 2 }
 0xa96   :  { %1396 = vpow2.f32 %v1268_v1 }
 0xa97   :  { %1398 = vtanh.f32 %v774_v38 }
 0xaa0   :  { %v1397_v39 = vpop.eup %1396 }
 0xaa1   :  { %v770_v14 = vadd.f32 1.0, %v1397_v39  ;;  %v1399_v40 = vpop.eup %1398 }
 0xaa3   :  { %1400 = vrcp.f32 %v770_v14 }
 0xaad   :  { %v1401_v41 = vpop.eup %1400 }
 0xaae   :  { %v788_v42 = vmul.f32 %v1401_v41, %v1399_v40  ;;  %v787_v43 = vmul.f32 %v1401_v41, %v700_v13 }
 0xab0   :  { %790 = vrot.lane.b32.xlu0 %v788_v42, %s1481_s29 }
 0xb06   :  { %v778_v47 = vpop.permute.xlu1 %777 }
 0xb07   :  { %v779_v48 = vrot.slane %v778_v47, 2 }
 0xb09   :  { %v1269_v49 = vmul.f32 -1.442695, %v779_v48 }
 0xb22   :  { %v791_v44 = vpop.permute.xlu0 %790 }
 0xb23   :  { %v1726_v45 = vadd.f32 %v791_v44, %v787_v43 }
 0xb25   :  { %1402 = vtanh.f32 %v1726_v45 }
 0xb26   :  { %1404 = vpow2.f32 %v1269_v49 }
 0xb2f   :  { %v1403_v46 = vpop.eup %1402 }
 0xb30   :  { %796 = vrot.lane.b32.xlu0 %v1403_v46, %s1481_s29  ;;  %v1405_v50 = vpop.eup %1404 }
 0xb31   :  { %v784_v51 = vadd.f32 1.0, %v1405_v50 }
 0xb33   :  { %1406 = vrcp.f32 %v784_v51 }
 0xb3d   :  { %v1407_v52 = vpop.eup %1406 }
 0xba2   :  { %v797_v53 = vpop.permute.xlu0 %796 }
 0xba3   :  { %v799_v54 = vmul.f32 %v1407_v52, %v797_v53 }
 0xba5   :  { %801 = vst.msk [vmem:[#allocation3 + $0xa] sm:$0x3] %vm335_vm2, %v799_v54  ;;  %v803_v55 = vpack.c.bf16 %v799_v54, %v799_v54 }
 0xba7   :  { %1270 = vmatmul.mubr.msk.bf16.vlgmr.msra.gmra.mrb[12].mxu1 %vm234_vm1, %v803_v55 }
 0xbac   :  { %v1063_v59 = vld [vmem:[#allocation3 + $0xa] sm:$0x3] }
 0xbad   :  { %v1130_v60 = vld [vmem:[#allocation3 + $0xa] sm:$0x3]  ;;  %v1064_v62 = vsel %vm72_vm0, %v1062_v56, %v1063_v59 }
 0xbae   :  { %v1132_v63 = vsel %vm72_vm0, %v1130_v60, %v1131_v57  ;;  %v1303_v5 = vpack.c.bf16 %v1064_v62, %v1064_v62  ;;  %v1164_v60 = vld [vmem:[%s1916_s6] sm:$0x8] }
 0xbaf   :  { %v1306_v7 = vpack.c.bf16 %v1132_v63, %v1132_v63  ;;  %v1296_v63 = vld [vmem:[%s1916_s6 + $0x4] sm:$0x8] }
 0xbb0   :  { %v1069_v15 = vrot.slane %v1303_v5, 7  ;;  %v1078_v16 = vshrl.u32 %v1303_v5, 16 }
 0xbb1   :  { %v1138_v17 = vshll.u32 %v1306_v7, 16  ;;  %v1147_v18 = vrot.slane %v1306_v7, 6 }
 0xbb2   :  { %v1075_v22 = vsel %vm1736_vm9, %v1069_v15, %v1074_v9  ;;  %v1080_v23 = vrot.slane %v1078_v16, 7 }
 0xbb3   :  { %v1140_v24 = vrot.slane %v1138_v17, 6  ;;  %v1150_v25 = vsel %vm1744_vm10, %v1147_v18, %v1293_v21  ;;  %1076 = vst [vmem:[%s1916_s6] sm:$0x2] %v1075_v22  ;;  %v895_v18 = vld [vmem:[#allocation2 + $0x1c] sm:$0xf] }
 0xbb4   :  { %1294 = vst [vmem:[%s1916_s6 + $0x4] sm:$0x4] %v1150_v25  ;;  %v1083_v27 = vsel %vm1736_vm9, %v1080_v23, %v1284_v20 }
 0xbb5   :  { %v1145_v28 = vsel %vm1744_vm10, %v1140_v24, %v1144_v26  ;;  %1285 = vst [vmem:[%s1916_s6 + $0x4] sm:$0x2] %v1083_v27 }
 0xbb6   :  { %1146 = vst [vmem:[%s1916_s6] sm:$0x4] %v1145_v28 }
 0xbba   :  { %v1099_v29 = vld [vmem:[%s1916_s6] sm:$0x2] }
 0xbbb   :  { %v1100_v8 = vsel %vm1098_vm12, %v1095_v2, %v1099_v29 }
 0xbbc   :  { %1101 = vst [vmem:[%s1916_s6] sm:$0x2] %v1100_v8  ;;  %v1287_v31 = vld [vmem:[%s1916_s6 + $0x4] sm:$0x2] }
 0xbbd   :  { %v1105_v10 = vsel %vm1098_vm12, %v1102_v6, %v1287_v31 }
 0xbbe   :  { %1288 = vst [vmem:[%s1916_s6 + $0x4] sm:$0x2] %v1105_v10 }
 0xc7a   :  { %v841_v11 = vpop.f32.mrb[12].mxu1 }
 0xc7b   :  { %v843_v32 = vpop.f32.mrb[13].mxu1 }
 0xc7c   :  { %v850_v33 = vcombine.low %v841_v11, %v843_v32  ;;  %v845_v34 = vpop.f32.mrb[14].mxu1 }
 0xc7d   :  { %v846_v35 = vpop.f32.mrb[15].mxu1 }
 0xc7e   :  { %v857_v12 = vrot.slane %v850_v33, %v1630_v30 }
 0xc80   :  { %v859_v37 = vadd.f32 %v857_v12, %v802_v36  ;;  %v1020_v36 = vld [vmem:[#allocation3] sm:$0x3] }
 0xc82   :  { %870 = vrot.lane.b32.xlu0 %v859_v37, %s1481_s29  ;;  %v1271_v1 = vmul.f32 -1.442695, %v859_v37  ;;  %v867_v38 = vrot.slane %v859_v37, 2  ;;  %v1176_v37 = vld [vmem:[#allocation3] sm:$0x3] }
 0xc84   :  { %1408 = vpow2.f32 %v1271_v1 }
 0xc85   :  { %1410 = vtanh.f32 %v867_v38 }
 0xc8e   :  { %v1409_v39 = vpop.eup %1408 }
 0xc8f   :  { %v863_v14 = vadd.f32 1.0, %v1409_v39  ;;  %v1411_v40 = vpop.eup %1410 }
 0xc91   :  { %1412 = vrcp.f32 %v863_v14 }
 0xc9b   :  { %v1413_v41 = vpop.eup %1412 }
 0xc9c   :  { %v881_v42 = vmul.f32 %v1413_v41, %v1411_v40  ;;  %v880_v43 = vmul.f32 %v1413_v41, %v1726_v45  ;;  %v1153_v45 = vld [vmem:[#allocation3 + $0x2] sm:$0x3] }
 0xc9e   :  { %883 = vrot.lane.b32.xlu1 %v881_v42, %s1481_s29  ;;  %v1043_v42 = vld [vmem:[#allocation3 + $0x2] sm:$0x3] }
 0xcf4   :  { %v871_v48 = vpop.permute.xlu0 %870 }
 0xcf5   :  { %v872_v49 = vrot.slane %v871_v48, 2  ;;  %v1278_v48 = vld [vmem:[%s1916_s6 + $0x4] sm:$0x1] }
 0xcf7   :  { %v1272_v50 = vmul.f32 -1.442695, %v872_v49 }
 0xd10   :  { %v884_v44 = vpop.permute.xlu1 %883 }
 0xd11   :  { %v886_v46 = vadd.f32 %v884_v44, %v880_v43 }
 0xd13   :  { %1414 = vtanh.f32 %v886_v46 }
 0xd14   :  { %1416 = vpow2.f32 %v1272_v50 }
 0xd1d   :  { %v1415_v47 = vpop.eup %1414 }
 0xd1e   :  { %889 = vrot.lane.b32.xlu1 %v1415_v47, %s1481_s29  ;;  %v1417_v51 = vpop.eup %1416 }
 0xd1f   :  { %v877_v52 = vadd.f32 1.0, %v1417_v51 }
 0xd21   :  { %1418 = vrcp.f32 %v877_v52 }
 0xd2b   :  { %v1419_v53 = vpop.eup %1418 }
 0xd90   :  { %v890_v54 = vpop.permute.xlu1 %889 }
 0xd91   :  { %v892_v55 = vmul.f32 %v1419_v53, %v890_v54 }
 0xd93   :  { %894 = vst.msk [vmem:[#allocation3 + $0xc] sm:$0x3] %vm335_vm2, %v892_v55  ;;  %v896_v56 = vpack.c.bf16 %v892_v55, %v892_v55 }
 0xd95   :  { %1273 = vmatmul.mubr.msk.bf16.vlgmr.msra.gmra.mrb[16].mxu0 %vm234_vm1, %v896_v56  ;;  %vm988_vm1 = vcmask 254976  }
 0xd9a   :  { %v1152_v57 = vld [vmem:[#allocation3 + $0xc] sm:$0x3] }
 0xd9b   :  { %v1154_v58 = vsel %vm72_vm0, %v1152_v57, %v1153_v45  ;;  %v1044_v1 = vld [vmem:[#allocation3 + $0xc] sm:$0x3] }
 0xd9c   :  { %v1307_v59 = vpack.c.bf16 %v1154_v58, %v1154_v58  ;;  %v1045_v47 = vsel %vm72_vm0, %v1043_v42, %v1044_v1 }
 0xd9d   :  { %v1046_v45 = vpack.c.bf16 %v1045_v47, %v1045_v47 }
 0xd9e   :  { %v1159_v61 = vrot.slane %v1307_v59, 5  ;;  %v1168_v62 = vshrl.u32 %v1307_v59, 16 }
 0xd9f   :  { %v1051_v59 = vshll.u32 %v1046_v45, 16 }
 0xda0   :  { %v1165_v0 = vsel %vm1163_vm15, %v1159_v61, %v1164_v60  ;;  %v1170_v3 = vrot.slane %v1168_v62, 5 }
 0xda1   :  { %1166 = vst [vmem:[%s1916_s6] sm:$0x8] %v1165_v0 }
 0xda2   :  { %v1173_v5 = vsel %vm1163_vm15, %v1170_v3, %v1296_v63 }
 0xda3   :  { %1297 = vst [vmem:[%s1916_s6 + $0x4] sm:$0x8] %v1173_v5 }
 0xda8   :  { %v1189_v57 = vld [vmem:[%s1916_s6] sm:$0x8] }
 0xdaa   :  { %v1299_v53 = vld [vmem:[%s1916_s6 + $0x4] sm:$0x8] }
 0xe68   :  { %v934_v7 = vpop.f32.mrb[16].mxu0 }
 0xe69   :  { %v936_v9 = vpop.f32.mrb[17].mxu0 }
 0xe6a   :  { %v943_v13 = vcombine.low %v934_v7, %v936_v9  ;;  %v938_v15 = vpop.f32.mrb[18].mxu0 }
 0xe6b   :  { %v939_v16 = vpop.f32.mrb[19].mxu0 }
 0xe6c   :  { %v950_v17 = vrot.slane %v943_v13, %v1630_v30 }
 0xe6e   :  { %v952_v19 = vadd.f32 %v950_v17, %v895_v18 }
 0xe70   :  { %963 = vrot.lane.b32.xlu1 %v952_v19, %s1481_s29  ;;  %v1274_v20 = vmul.f32 -1.442695, %v952_v19  ;;  %v960_v21 = vrot.slane %v952_v19, 2 }
 0xe72   :  { %1420 = vpow2.f32 %v1274_v20 }
 0xe73   :  { %1422 = vtanh.f32 %v960_v21 }
 0xe7c   :  { %v1421_v22 = vpop.eup %1420 }
 0xe7d   :  { %v956_v23 = vadd.f32 1.0, %v1421_v22  ;;  %v1423_v24 = vpop.eup %1422 }
 0xe7f   :  { %1424 = vrcp.f32 %v956_v23 }
 0xe89   :  { %v1425_v25 = vpop.eup %1424 }
 0xe8a   :  { %v974_v26 = vmul.f32 %v1425_v25, %v1423_v24  ;;  %v973_v27 = vmul.f32 %v1425_v25, %v886_v46 }
 0xe8c   :  { %976 = vrot.lane.b32.xlu0 %v974_v26, %s1481_s29 }
 0xee2   :  { %v964_v6 = vpop.permute.xlu1 %963 }
 0xee3   :  { %v965_v8 = vrot.slane %v964_v6, 2 }
 0xee5   :  { %v1275_v31 = vmul.f32 -1.442695, %v965_v8 }
 0xefe   :  { %v977_v28 = vpop.permute.xlu0 %976 }
 0xeff   :  { %v979_v4 = vadd.f32 %v977_v28, %v973_v27 }
 0xf01   :  { %1426 = vtanh.f32 %v979_v4  ;;  %v1010_v29 = vrot.slane %v979_v4, %v1630_v30 }
 0xf02   :  { %1428 = vpow2.f32 %v1275_v31 }
 0xf0b   :  { %v1427_v2 = vpop.eup %1426 }
 0xf0c   :  { %982 = vrot.lane.b32.xlu0 %v1427_v2, %s1481_s29  ;;  %v1429_v10 = vpop.eup %1428 }
 0xf0d   :  { %v970_v11 = vadd.f32 1.0, %v1429_v10 }
 0xf0f   :  { %1430 = vrcp.f32 %v970_v11 }
 0xf10   :  { %1011 = vrot.lane.b32.xlu0 %v1010_v29, %s1481_s29  ;;  %s1483_s29 = smov 96  }
 0xf19   :  { %v1431_v32 = vpop.eup %1430 }
 0xf7e   :  { %v983_v33 = vpop.permute.xlu0 %982 }
 0xf7f   :  { %v985_v34 = vmul.f32 %v1431_v32, %v983_v33 }
 0xf81   :  { %987 = vst.msk [vmem:[#allocation3 + $0xe] sm:$0x3] %vm335_vm2, %v985_v34  ;;  %v997_v35 = vrot.slane %v985_v34, %v1630_v30  ;;  %vm1823_vm2 = vmand %vm1024_vm3, %vm1025_vm4  ;;  %v1027_v30 = vld [vmem:[%s1916_s6] sm:$0x1] }
 0xf82   :  { %989 = vst.msk [vmem:[#allocation4] sm:$0x3] %vm988_vm1, %v985_v34  ;;  %v1012_v12 = vpop.permute.xlu0 %1011 }
 0xf83   :  { %1014 = vst.msk [vmem:[#allocation6] sm:$0x3] %vm988_vm1, %v1012_v12  ;;  %998 = vrot.lane.b32.xlu1 %v997_v35, %s1483_s29  ;;  %s1486_s29 = smov [#allocation6]  }
 0xf84   :  { %s1216_s24 = sshll.u32 %s1486_s29, 4  ;;  %s1217_s24 = int_to_ptr.vmem [resolvable:$true] %s1216_s24 }
 0xf87   :  { %1015 = vrot.lane.b32.xlu1 %v1010_v29, %s1484_s23 }
 0xf88   :  { %v1021_v38 = vld [vmem:[#allocation3 + $0xe] sm:$0x3] }
 0xf89   :  { %v1175_v39 = vld [vmem:[#allocation3 + $0xe] sm:$0x3]  ;;  %v1022_v40 = vsel %vm72_vm0, %v1020_v36, %v1021_v38 }
 0xf8a   :  { %v1177_v41 = vsel %vm72_vm0, %v1175_v39, %v1176_v37  ;;  %v1023_v43 = vpack.c.bf16 %v1022_v40, %v1022_v40  ;;  %vm1054_vm0 = vsmask.f32 7938 }
 0xf8b   :  { %v1308_v44 = vpack.c.bf16 %v1177_v41, %v1177_v41  ;;  %vm1055_vm7 = vmand %vm1024_vm3, %vm1054_vm0 }
 0xf8c   :  { %v1028_v49 = vsel %vm1823_vm2, %v1023_v43, %v1027_v30  ;;  %v1034_v50 = vshrl.u32 %v1023_v43, 16 }
 0xf8d   :  { %v1183_v51 = vshll.u32 %v1308_v44, 16  ;;  %v1192_v52 = vrot.slane %v1308_v44, 5  ;;  %1029 = vst [vmem:[%s1916_s6] sm:$0x1] %v1028_v49 }
 0xf8e   :  { %v1041_v54 = vsel %vm1823_vm2, %v1034_v50, %v1278_v48 }
 0xf8f   :  { %v1185_v55 = vrot.slane %v1183_v51, 5  ;;  %v1195_v56 = vsel %vm1833_vm6, %v1192_v52, %v1299_v53  ;;  %1279 = vst [vmem:[%s1916_s6 + $0x4] sm:$0x1] %v1041_v54 }
 0xf90   :  { %1300 = vst [vmem:[%s1916_s6 + $0x4] sm:$0x8] %v1195_v56 }
 0xf91   :  { %v1190_v58 = vsel %vm1833_vm6, %v1185_v55, %v1189_v57 }
 0xf92   :  { %1191 = vst [vmem:[%s1916_s6] sm:$0x8] %v1190_v58 }
 0xf94   :  { %v1056_v60 = vld [vmem:[%s1916_s6] sm:$0x1] }
 0xf95   :  { %v1057_v61 = vsel %vm1055_vm7, %v1051_v59, %v1056_v60 }
 0xf96   :  { %1058 = vst [vmem:[%s1916_s6] sm:$0x1] %v1057_v61  ;;  %v1281_v62 = vld [vmem:[%s1916_s6 + $0x4] sm:$0x1] }
 0xf97   :  { %v1060_v63 = vsel %vm1055_vm7, %v1046_v45, %v1281_v62 }
 0xf98   :  { %1282 = vst [vmem:[%s1916_s6 + $0x4] sm:$0x1] %v1060_v63 }
 0xff5   :  { %v999_v0 = vpop.permute.xlu1 %998 }
 0xff6   :  { %1002 = vst.msk [vmem:[#allocation4 + $0x2] sm:$0x3] %vm988_vm1, %v999_v0 }
 0xff7   :  { %1443 = shalt.err (!%p1440_p4)
}
 0xff8   :  { %s1444_s27 = scalar_lea.hbm %s1917_s7, 64 }
 0xff9   :  { %p1445_p5 = scmp.ne.s32.totalorder %s1917_s7, %s1444_s27  ;;  %p1448_p6 = scmp.lt.u32.totalorder %s1444_s27, %s1917_s7 }
 0xffb   :  { %p1450_p7 = pnand %p1448_p6, %p1445_p5 }
 0xffd   :  { %1453 = shalt.err (!%p1450_p7)
}
 0xffe   :  { %s1487_s9 = smov 2   ;;  %v1016_v3 = vpop.permute.xlu1 %1015  ;;  %s1454_s2 = scalar_lea.vmem %s1217_s24, 64 }
 0xfff   :  { %1210 = dma.vmem_to_hbm [thread:$0]  %s1205_s22, 64, %s1917_s7, [#allocation5], %s1484_s23, %s1484_s23, %s1487_s9   ;;  %1019 = vst.msk [vmem:[#allocation6 + $0x2] sm:$0x3] %vm988_vm1, %v1016_v3 }
0x1000   :  { %p1455_p8 = scmp.ne.s32.totalorder %s1217_s24, %s1454_s2  ;;  %p1459_p9 = scmp.lt.s32.totalorder %s1217_s24, %s1217_s24 }
0x1001   :  { %p1460_p10 = scmp.lt.s32.totalorder %s1454_s2, %s1454_s2 }
0x1003   :  { %p1461_p11 = por %p1460_p10, %p1459_p9 }
0x1005   :  { %p1462_p12 = pnand %p1461_p11, %p1455_p8 }
0x1007   :  { %1465 = shalt.err (!%p1462_p12)
}
0x1008   :  { %s1466_s5 = scalar_lea.hbm %s1918_s8, 64 }
0x1009   :  { %p1467_p13 = scmp.ne.s32.totalorder %s1918_s8, %s1466_s5  ;;  %p1470_p0 = scmp.lt.u32.totalorder %s1466_s5, %s1918_s8 }
0x100b   :  { %p1472_p1 = pnand %p1470_p0, %p1467_p13 }
0x100d   :  { %1475 = shalt.err (!%p1472_p1)
}
0x100e   :  { %1222 = dma.vmem_to_hbm [thread:$0]  %s1217_s24, 64, %s1918_s8, [#allocation7], %s1484_s23, %s1484_s23, %s1487_s9  }
0x100f   :  { %1476 = dma.done.wait [#allocation5], 64  }
0x1010   :  { %1477 = vsyncadd [#allocation5], 4294967232 }
0x1011   :  { %1478 = dma.done.wait [#allocation7], 64  }
0x1012   :  { %1479 = vsyncadd [#allocation7], 4294967232 }
0x1013   :  { %1231 = vsyncpa [#allocation5], 1 }
0x1014   :  { %1232 = vsyncpa [#allocation7], 1 }

</bundles_post_ra>
